<compile_context>
chip_gen: v6e
topology: v6e:2x2x1
jax: 0.10.0
libtpu: 0.0.40
codegen_flags: <defaults>
</compile_context>

<pallas_src>
import functools

import jax
import jax.numpy as jnp
import numpy as np
from jax import lax
from jax.experimental import pallas as pl
from jax.experimental.pallas import tpu as pltpu

EPS = 1e-5


def _round_up(x, m):
    return (x + m - 1) // m * m


# --------------------------------------------------------------------------- #
# Pass 1: per-batch-element BatchNorm statistics of conv1 (mean and centered M2)
# --------------------------------------------------------------------------- #
def _bn_stats_kernel(w_pad, n_valid, x_ref, w1_ref, mask_ref, mean_ref, m2_ref):
    """x_ref: (Cin, L) zero-padded flattened image; w1_ref: (9, C, Cin);
    mask_ref: (1, P) valid-pixel mask; mean_ref/m2_ref: (C, 1) per-batch partials."""
    p = mask_ref.shape[1]
    c = w1_ref.shape[1]

    acc = jnp.zeros((c, p), jnp.float32)
    for k in range(9):                              # 9 contiguous lane-slice taps
        dy, dx = divmod(k, 3)
        acc = acc + jnp.dot(w1_ref[k], x_ref[:, pl.ds(dy * w_pad + dx, p)],
                            preferred_element_type=jnp.float32)

    m = mask_ref[...]                               # (1, P) 1.0 / 0.0
    mean = jnp.sum(acc * m, axis=1, keepdims=True) * (1.0 / n_valid)   # (C, 1)
    d = (acc - mean) * m                            # centered -> no E[x^2]-E[x]^2
    mean_ref[...] = mean
    m2_ref[...] = jnp.sum(d * d, axis=1, keepdims=True)


# --------------------------------------------------------------------------- #
# Pass 2: fused conv1 + BN(scale/shift) + ReLU + conv2 + bias + sigmoid gate
# --------------------------------------------------------------------------- #
def _attention_fused_kernel(w_pad, x_ref, w1_ref, w2_ref, scale_ref, shift_ref,
                            b2_ref, mask_ref, y_ref, h_ref):
    """x_ref: (Cin, L); w1_ref: (9, C, Cin); w2_ref: (9, C, 1); scale/shift: (C, 1);
    b2_ref: (1, 1) SMEM scalar; mask_ref: (1, P); y_ref: (Cin, P) lane-dense output;
    h_ref: (C, L) VMEM scratch providing conv2's zero 'same'-padding halo."""
    p = y_ref.shape[1]
    c = w1_ref.shape[1]

    # conv1: 9 MXU matmuls over contiguous lane slices (lane-dense (C, P) results).
    acc = jnp.zeros((c, p), jnp.float32)
    for k in range(9):
        dy, dx = divmod(k, 3)
        acc = acc + jnp.dot(w1_ref[k], x_ref[:, pl.ds(dy * w_pad + dx, p)],
                            preferred_element_type=jnp.float32)

    # BatchNorm folded into one FMA, ReLU, then zero the out-of-image positions so
    # the halo buffer implements conv2's 'same' padding exactly.
    h = jnp.maximum(acc * scale_ref[...] + shift_ref[...], 0.0) * mask_ref[...]

    h_ref[...] = jnp.zeros_like(h_ref)
    h_ref[:, pl.ds(w_pad + 1, p)] = h

    # conv2 (C -> 1) on the VPU: 9 broadcast FMAs + one sublane reduction.
    acc2 = jnp.zeros((c, p), jnp.float32)
    for k in range(9):
        dy, dx = divmod(k, 3)
        acc2 = acc2 + w2_ref[k] * h_ref[:, pl.ds(dy * w_pad + dx, p)]
    h2 = jnp.sum(acc2, axis=0, keepdims=True) + b2_ref[0, 0]             # (1, P)

    # Sigmoid gate against x at the output positions (centre-tap slab); fully
    # lane-dense store of the (Cin, P) result.
    xc = x_ref[:, pl.ds(w_pad + 1, p)]                                   # (Cin, P)
    y_ref[...] = jax.nn.sigmoid(h2 * xc)


# --------------------------------------------------------------------------- #
# Wrapper
# --------------------------------------------------------------------------- #
def _vmem_limit_bytes(working_set_bytes):
    """Per-generation VMEM budget (v7x: 64 MiB per TensorCore, v5e/v6e: 128 MiB)."""
    try:
        cap = int(pltpu.get_tpu_info().vmem_capacity_bytes)
    except Exception:                       # fall back to the smallest (v7x) capacity
        cap = 64 << 20
    budget = (cap * 3) // 4                 # leave headroom for compiler scratch
    if working_set_bytes > budget:
        raise NotImplementedError(
            "whole-image working set exceeds the VMEM budget; this shape needs a "
            "row-tiled (halo DMA) variant")  # TODO(synk)
    return max(budget, 32 << 20)


@jax.jit
def attention_block_forward(x_nchw, params):
    n, cin, h, w = x_nchw.shape
    c = cin // 4
    w_pad, h_pad = w + 2, h + 2
    p_in = h_pad * w_pad            # flattened zero-padded image length
    p_out = h * w_pad               # computed flat output span (valid rows x padded width)
    l = _round_up(p_in + 2, 128)    # +2: bottom-right tap overhang; 128: lane-dense blocks

    # Zero-pad spatially, flatten (H, W) into the lane dim, pad the lane dim to L.
    x = x_nchw.astype(jnp.float32)
    x_flat = jnp.pad(x, ((0, 0), (0, 0), (1, 1), (1, 1))).reshape(n, cin, p_in)
    x_flat = jnp.pad(x_flat, ((0, 0), (0, 0), (0, l - p_in)))             # (N, Cin, L)

    # Static valid-pixel mask over the computed flat range q in [w_pad+1, w_pad+1+p_out):
    # a position is a real image pixel iff its padded column lies in [1, w].
    q = np.arange(p_out) + w_pad + 1
    col, row = q % w_pad, q // w_pad
    mask = ((col >= 1) & (col <= w) & (row >= 1) & (row <= h)).astype(np.float32)
    mask = jnp.asarray(mask[None, :])                                     # (1, P_out)

    # Conv weights as 9 taps (tap k = ky*3 + kx) shaped for (C, Cin) x (Cin, P) dots.
    w1_taps = jnp.transpose(params["w1"], (2, 3, 0, 1)).reshape(9, c, cin).astype(jnp.float32)
    w2_taps = jnp.transpose(params["w2"], (2, 3, 1, 0)).reshape(9, c, 1).astype(jnp.float32)

    x_spec = pl.BlockSpec((None, cin, l), lambda i: (i, 0, 0))
    w1_spec = pl.BlockSpec((9, c, cin), lambda i: (0, 0, 0))
    mask_spec = pl.BlockSpec((1, p_out), lambda i: (0, 0))
    stat_spec = pl.BlockSpec((None, c, 1), lambda i: (i, 0, 0))

    bytes_per_step = 4 * (2 * cin * l + 2 * cin * p_out + c * l) + (64 << 10)
    vmem_limit = _vmem_limit_bytes(bytes_per_step)

    # ---- pass 1: per-batch-element conv1 statistics (training-mode BatchNorm) ------
    mean_b, m2_b = pl.pallas_call(
        functools.partial(_bn_stats_kernel, w_pad, h * w),
        out_shape=(jax.ShapeDtypeStruct((n, c, 1), jnp.float32),
                   jax.ShapeDtypeStruct((n, c, 1), jnp.float32)),
        grid=(n,),
        in_specs=[x_spec, w1_spec, mask_spec],
        out_specs=(stat_spec, stat_spec),
        compiler_params=pltpu.CompilerParams(
            dimension_semantics=("parallel",), vmem_limit_bytes=vmem_limit),
    )(x_flat, w1_taps, mask)

    # Numerically stable cross-batch combination of the per-group (mean, M2) stats.
    n_pix = h * w
    mean_b = mean_b[..., 0]                                    # (N, C)
    m2_b = m2_b[..., 0]                                        # (N, C)
    mean = jnp.mean(mean_b, axis=0)                            # (C,)
    m2 = jnp.sum(m2_b, axis=0) + n_pix * jnp.sum((mean_b - mean[None, :]) ** 2, axis=0)
    var = jnp.maximum(m2 / (n * n_pix), 0.0)                   # biased training-mode var
    scale_c = params["gamma"].astype(jnp.float32) * lax.rsqrt(var + EPS)
    shift_c = params["beta"].astype(jnp.float32) - scale_c * mean   # b1 cancels inside BN
    scale = scale_c.reshape(c, 1)
    shift = shift_c.reshape(c, 1)
    b2 = params["b2"].reshape(1, 1).astype(jnp.float32)

    # ---- pass 2: fused conv1 + BN + ReLU + conv2 + bias + sigmoid gate --------------
    cost = pl.CostEstimate(
        flops=int(2 * 9 * n * p_out * c * (cin + 1)),
        transcendentals=int(n * cin * p_out),
        bytes_accessed=int(4 * n * cin * (l + p_out)))

    y_flat = pl.pallas_call(
        functools.partial(_attention_fused_kernel, w_pad),
        out_shape=jax.ShapeDtypeStruct((n, cin, p_out), jnp.float32),
        grid=(n,),
        in_specs=[x_spec, w1_spec,
                  pl.BlockSpec((9, c, 1), lambda i: (0, 0, 0)),
                  pl.BlockSpec((c, 1), lambda i: (0, 0)),
                  pl.BlockSpec((c, 1), lambda i: (0, 0)),
                  pl.BlockSpec(memory_space=pltpu.MemorySpace.SMEM),
                  mask_spec],
        out_specs=pl.BlockSpec((None, cin, p_out), lambda i: (i, 0, 0)),
        scratch_shapes=[pltpu.VMEM((c, l), jnp.float32)],
        compiler_params=pltpu.CompilerParams(
            dimension_semantics=("parallel",), vmem_limit_bytes=vmem_limit),
        cost_estimate=cost,
    )(x_flat, w1_taps, w2_taps, scale, shift, b2, mask)

    # Flat computed span -> (H, W_pad) rows; drop the two out-of-image columns.
    y = y_flat.reshape(n, cin, h, w_pad)[:, :, :, :w]
    return y


# --------------------------------------------------------------------------- #
# Pure-JAX reference (full f32 precision) for self-validation
# --------------------------------------------------------------------------- #
def reference_forward(x, params):
    dn = ("NCHW", "OIHW", "NCHW")
    hi = lax.conv_general_dilated(x, params["w1"], (1, 1), [(1, 1), (1, 1)],
                                  dimension_numbers=dn,
                                  precision=lax.Precision.HIGHEST)
    hi = hi + params["b1"][None, :, None, None]
    mean = jnp.mean(hi, axis=(0, 2, 3), keepdims=True)
    var = jnp.mean((hi - mean) ** 2, axis=(0, 2, 3), keepdims=True)
    hi = (hi - mean) / jnp.sqrt(var + EPS) * params["gamma"][None, :, None, None] \
        + params["beta"][None, :, None, None]
    hi = jnp.maximum(hi, 0.0)
    h2 = lax.conv_general_dilated(hi, params["w2"], (1, 1), [(1, 1), (1, 1)],
                                  dimension_numbers=dn,
                                  precision=lax.Precision.HIGHEST)
    h2 = h2 + params["b2"][None, :, None, None]
    return jax.nn.sigmoid(h2 * x)


# --------------------------------------------------------------------------- #
if __name__ == "__main__":
    key = jax.random.PRNGKey(0)
    N, Cin, H, W = 2, 16, 16, 16          # channel_in = 16 -> channel = 4
    C = Cin // 4
    ks = jax.random.split(key, 7)

    x = jax.random.normal(ks[0], (N, Cin, H, W), jnp.float32)
    params = dict(
        w1=0.1 * jax.random.normal(ks[1], (C, Cin, 3, 3), jnp.float32),
        b1=0.1 * jax.random.normal(ks[2], (C,), jnp.float32),
        gamma=1.0 + 0.1 * jax.random.normal(ks[3], (C,), jnp.float32),
        beta=0.1 * jax.random.normal(ks[4], (C,), jnp.float32),
        w2=0.1 * jax.random.normal(ks[5], (1, C, 3, 3), jnp.float32),
        b2=0.1 * jax.random.normal(ks[6], (1,), jnp.float32),
    )

    y = jax.block_until_ready(attention_block_forward(x, params))
    y_ref = jax.block_until_ready(reference_forward(x, params))

    assert y.shape == x.shape and y.dtype == jnp.float32
    # MXU matmuls run at default precision (bf16 passes, f32 accumulate), so compare
    # against the HIGHEST-precision reference with a correspondingly loosened tolerance.
    if not jnp.allclose(y, y_ref, atol=2e-2, rtol=2e-2):
        max_err = float(jnp.max(jnp.abs(y - y_ref)))
        raise AssertionError(f"mismatch vs reference, max abs err = {max_err}")

    print("KERNEL_OK")
</pallas_src>

<mosaic_0001>
module attributes {stable_mosaic.version = 11 : i64} {
  func.func @_bn_stats_kernel(%arg0: i32, %arg1: memref<1x16x384xf32, #tpu.memory_space<vmem>>, %arg2: memref<9x4x16xf32, #tpu.memory_space<vmem>>, %arg3: memref<1x288xf32, #tpu.memory_space<vmem>>, %arg4: memref<1x4x1xf32, #tpu.memory_space<vmem>>, %arg5: memref<1x4x1xf32, #tpu.memory_space<vmem>>) attributes {dimension_semantics = [#tpu.dimension_semantics<parallel>], iteration_bounds = array<i64: 2>, scalar_prefetch = 0 : i64, scratch_operands = 0 : i64, tpu.core_type = #tpu.core_type<tc>, window_params = [{transform_indices = @transform_0, window_bounds = array<i64: 1, 16, 384>}, {pipeline_mode = #tpu.pipeline_mode<synchronous>, transform_indices = @transform_1, window_bounds = array<i64: 9, 4, 16>}, {pipeline_mode = #tpu.pipeline_mode<synchronous>, transform_indices = @transform_2, window_bounds = array<i64: 1, 288>}, {transform_indices = @transform_3, window_bounds = array<i64: 1, 4, 1>}, {transform_indices = @transform_4, window_bounds = array<i64: 1, 4, 1>}]} {
    %cst = arith.constant 0.000000e+00 : f32
    %0 = vector.broadcast %cst : f32 to vector<4x288xf32>
    %c0 = arith.constant 0 : index
    %c0_0 = arith.constant 0 : index
    %c0_1 = arith.constant 0 : index
    %1 = vector.load %arg2[%c0, %c0_0, %c0_1] : memref<9x4x16xf32, #tpu.memory_space<vmem>>, vector<1x4x16xf32>
    %2 = vector.shape_cast %1 : vector<1x4x16xf32> to vector<4x16xf32>
    %c0_2 = arith.constant 0 : index
    %c0_3 = arith.constant 0 : index
    %c0_4 = arith.constant 0 : index
    %3 = vector.load %arg1[%c0_2, %c0_3, %c0_4] : memref<1x16x384xf32, #tpu.memory_space<vmem>>, vector<1x16x288xf32>
    %4 = vector.shape_cast %3 : vector<1x16x288xf32> to vector<16x288xf32>
    %cst_5 = arith.constant dense<0.000000e+00> : vector<4x288xf32>
    %5 = tpu.matmul %2, %4, %cst_5 {dimension_numbers = #tpu.dot_dimension_numbers<[1], [0], [0], [1], [0, 0, 1, 1], [], []>} : vector<4x16xf32>, vector<16x288xf32>, vector<4x288xf32> -> vector<4x288xf32>
    %6 = arith.addf %0, %5 : vector<4x288xf32>
    %c1 = arith.constant 1 : index
    %c0_6 = arith.constant 0 : index
    %c0_7 = arith.constant 0 : index
    %7 = vector.load %arg2[%c1, %c0_6, %c0_7] : memref<9x4x16xf32, #tpu.memory_space<vmem>>, vector<1x4x16xf32>
    %8 = vector.shape_cast %7 : vector<1x4x16xf32> to vector<4x16xf32>
    %c0_8 = arith.constant 0 : index
    %c0_9 = arith.constant 0 : index
    %c1_10 = arith.constant 1 : index
    %9 = vector.load %arg1[%c0_8, %c0_9, %c1_10] : memref<1x16x384xf32, #tpu.memory_space<vmem>>, vector<1x16x288xf32>
    %10 = vector.shape_cast %9 : vector<1x16x288xf32> to vector<16x288xf32>
    %cst_11 = arith.constant dense<0.000000e+00> : vector<4x288xf32>
    %11 = tpu.matmul %8, %10, %cst_11 {dimension_numbers = #tpu.dot_dimension_numbers<[1], [0], [0], [1], [0, 0, 1, 1], [], []>} : vector<4x16xf32>, vector<16x288xf32>, vector<4x288xf32> -> vector<4x288xf32>
    %12 = arith.addf %6, %11 : vector<4x288xf32>
    %c2 = arith.constant 2 : index
    %c0_12 = arith.constant 0 : index
    %c0_13 = arith.constant 0 : index
    %13 = vector.load %arg2[%c2, %c0_12, %c0_13] : memref<9x4x16xf32, #tpu.memory_space<vmem>>, vector<1x4x16xf32>
    %14 = vector.shape_cast %13 : vector<1x4x16xf32> to vector<4x16xf32>
    %c0_14 = arith.constant 0 : index
    %c0_15 = arith.constant 0 : index
    %c2_16 = arith.constant 2 : index
    %15 = vector.load %arg1[%c0_14, %c0_15, %c2_16] : memref<1x16x384xf32, #tpu.memory_space<vmem>>, vector<1x16x288xf32>
    %16 = vector.shape_cast %15 : vector<1x16x288xf32> to vector<16x288xf32>
    %cst_17 = arith.constant dense<0.000000e+00> : vector<4x288xf32>
    %17 = tpu.matmul %14, %16, %cst_17 {dimension_numbers = #tpu.dot_dimension_numbers<[1], [0], [0], [1], [0, 0, 1, 1], [], []>} : vector<4x16xf32>, vector<16x288xf32>, vector<4x288xf32> -> vector<4x288xf32>
    %18 = arith.addf %12, %17 : vector<4x288xf32>
    %c3 = arith.constant 3 : index
    %c0_18 = arith.constant 0 : index
    %c0_19 = arith.constant 0 : index
    %19 = vector.load %arg2[%c3, %c0_18, %c0_19] : memref<9x4x16xf32, #tpu.memory_space<vmem>>, vector<1x4x16xf32>
    %20 = vector.shape_cast %19 : vector<1x4x16xf32> to vector<4x16xf32>
    %c0_20 = arith.constant 0 : index
    %c0_21 = arith.constant 0 : index
    %c18 = arith.constant 18 : index
    %21 = vector.load %arg1[%c0_20, %c0_21, %c18] : memref<1x16x384xf32, #tpu.memory_space<vmem>>, vector<1x16x288xf32>
    %22 = vector.shape_cast %21 : vector<1x16x288xf32> to vector<16x288xf32>
    %cst_22 = arith.constant dense<0.000000e+00> : vector<4x288xf32>
    %23 = tpu.matmul %20, %22, %cst_22 {dimension_numbers = #tpu.dot_dimension_numbers<[1], [0], [0], [1], [0, 0, 1, 1], [], []>} : vector<4x16xf32>, vector<16x288xf32>, vector<4x288xf32> -> vector<4x288xf32>
    %24 = arith.addf %18, %23 : vector<4x288xf32>
    %c4 = arith.constant 4 : index
    %c0_23 = arith.constant 0 : index
    %c0_24 = arith.constant 0 : index
    %25 = vector.load %arg2[%c4, %c0_23, %c0_24] : memref<9x4x16xf32, #tpu.memory_space<vmem>>, vector<1x4x16xf32>
    %26 = vector.shape_cast %25 : vector<1x4x16xf32> to vector<4x16xf32>
    %c0_25 = arith.constant 0 : index
    %c0_26 = arith.constant 0 : index
    %c19 = arith.constant 19 : index
    %27 = vector.load %arg1[%c0_25, %c0_26, %c19] : memref<1x16x384xf32, #tpu.memory_space<vmem>>, vector<1x16x288xf32>
    %28 = vector.shape_cast %27 : vector<1x16x288xf32> to vector<16x288xf32>
    %cst_27 = arith.constant dense<0.000000e+00> : vector<4x288xf32>
    %29 = tpu.matmul %26, %28, %cst_27 {dimension_numbers = #tpu.dot_dimension_numbers<[1], [0], [0], [1], [0, 0, 1, 1], [], []>} : vector<4x16xf32>, vector<16x288xf32>, vector<4x288xf32> -> vector<4x288xf32>
    %30 = arith.addf %24, %29 : vector<4x288xf32>
    %c5 = arith.constant 5 : index
    %c0_28 = arith.constant 0 : index
    %c0_29 = arith.constant 0 : index
    %31 = vector.load %arg2[%c5, %c0_28, %c0_29] : memref<9x4x16xf32, #tpu.memory_space<vmem>>, vector<1x4x16xf32>
    %32 = vector.shape_cast %31 : vector<1x4x16xf32> to vector<4x16xf32>
    %c0_30 = arith.constant 0 : index
    %c0_31 = arith.constant 0 : index
    %c20 = arith.constant 20 : index
    %33 = vector.load %arg1[%c0_30, %c0_31, %c20] : memref<1x16x384xf32, #tpu.memory_space<vmem>>, vector<1x16x288xf32>
    %34 = vector.shape_cast %33 : vector<1x16x288xf32> to vector<16x288xf32>
    %cst_32 = arith.constant dense<0.000000e+00> : vector<4x288xf32>
    %35 = tpu.matmul %32, %34, %cst_32 {dimension_numbers = #tpu.dot_dimension_numbers<[1], [0], [0], [1], [0, 0, 1, 1], [], []>} : vector<4x16xf32>, vector<16x288xf32>, vector<4x288xf32> -> vector<4x288xf32>
    %36 = arith.addf %30, %35 : vector<4x288xf32>
    %c6 = arith.constant 6 : index
    %c0_33 = arith.constant 0 : index
    %c0_34 = arith.constant 0 : index
    %37 = vector.load %arg2[%c6, %c0_33, %c0_34] : memref<9x4x16xf32, #tpu.memory_space<vmem>>, vector<1x4x16xf32>
    %38 = vector.shape_cast %37 : vector<1x4x16xf32> to vector<4x16xf32>
    %c0_35 = arith.constant 0 : index
    %c0_36 = arith.constant 0 : index
    %c36 = arith.constant 36 : index
    %39 = vector.load %arg1[%c0_35, %c0_36, %c36] : memref<1x16x384xf32, #tpu.memory_space<vmem>>, vector<1x16x288xf32>
    %40 = vector.shape_cast %39 : vector<1x16x288xf32> to vector<16x288xf32>
    %cst_37 = arith.constant dense<0.000000e+00> : vector<4x288xf32>
    %41 = tpu.matmul %38, %40, %cst_37 {dimension_numbers = #tpu.dot_dimension_numbers<[1], [0], [0], [1], [0, 0, 1, 1], [], []>} : vector<4x16xf32>, vector<16x288xf32>, vector<4x288xf32> -> vector<4x288xf32>
    %42 = arith.addf %36, %41 : vector<4x288xf32>
    %c7 = arith.constant 7 : index
    %c0_38 = arith.constant 0 : index
    %c0_39 = arith.constant 0 : index
    %43 = vector.load %arg2[%c7, %c0_38, %c0_39] : memref<9x4x16xf32, #tpu.memory_space<vmem>>, vector<1x4x16xf32>
    %44 = vector.shape_cast %43 : vector<1x4x16xf32> to vector<4x16xf32>
    %c0_40 = arith.constant 0 : index
    %c0_41 = arith.constant 0 : index
    %c37 = arith.constant 37 : index
    %45 = vector.load %arg1[%c0_40, %c0_41, %c37] : memref<1x16x384xf32, #tpu.memory_space<vmem>>, vector<1x16x288xf32>
    %46 = vector.shape_cast %45 : vector<1x16x288xf32> to vector<16x288xf32>
    %cst_42 = arith.constant dense<0.000000e+00> : vector<4x288xf32>
    %47 = tpu.matmul %44, %46, %cst_42 {dimension_numbers = #tpu.dot_dimension_numbers<[1], [0], [0], [1], [0, 0, 1, 1], [], []>} : vector<4x16xf32>, vector<16x288xf32>, vector<4x288xf32> -> vector<4x288xf32>
    %48 = arith.addf %42, %47 : vector<4x288xf32>
    %c8 = arith.constant 8 : index
    %c0_43 = arith.constant 0 : index
    %c0_44 = arith.constant 0 : index
    %49 = vector.load %arg2[%c8, %c0_43, %c0_44] : memref<9x4x16xf32, #tpu.memory_space<vmem>>, vector<1x4x16xf32>
    %50 = vector.shape_cast %49 : vector<1x4x16xf32> to vector<4x16xf32>
    %c0_45 = arith.constant 0 : index
    %c0_46 = arith.constant 0 : index
    %c38 = arith.constant 38 : index
    %51 = vector.load %arg1[%c0_45, %c0_46, %c38] : memref<1x16x384xf32, #tpu.memory_space<vmem>>, vector<1x16x288xf32>
    %52 = vector.shape_cast %51 : vector<1x16x288xf32> to vector<16x288xf32>
    %cst_47 = arith.constant dense<0.000000e+00> : vector<4x288xf32>
    %53 = tpu.matmul %50, %52, %cst_47 {dimension_numbers = #tpu.dot_dimension_numbers<[1], [0], [0], [1], [0, 0, 1, 1], [], []>} : vector<4x16xf32>, vector<16x288xf32>, vector<4x288xf32> -> vector<4x288xf32>
    %54 = arith.addf %48, %53 : vector<4x288xf32>
    %c0_48 = arith.constant 0 : index
    %c0_49 = arith.constant 0 : index
    %55 = vector.load %arg3[%c0_48, %c0_49] : memref<1x288xf32, #tpu.memory_space<vmem>>, vector<1x288xf32>
    %56 = vector.broadcast %55 : vector<1x288xf32> to vector<4x288xf32>
    %57 = arith.mulf %54, %56 : vector<4x288xf32>
    %cst_50 = arith.constant dense<0.000000e+00> : vector<4xf32>
    %58 = vector.multi_reduction <add>, %57, %cst_50 [1] : vector<4x288xf32> to vector<4xf32>
    %59 = vector.shape_cast %58 : vector<4xf32> to vector<4x1xf32>
    %cst_51 = arith.constant 3.906250e-03 : f32
    %60 = vector.broadcast %cst_51 : f32 to vector<4x1xf32>
    %61 = arith.mulf %59, %60 : vector<4x1xf32>
    %62 = vector.broadcast %61 : vector<4x1xf32> to vector<4x288xf32>
    %63 = arith.subf %54, %62 : vector<4x288xf32>
    %64 = vector.broadcast %55 : vector<1x288xf32> to vector<4x288xf32>
    %65 = arith.mulf %63, %64 : vector<4x288xf32>
    %c0_52 = arith.constant 0 : index
    %c0_53 = arith.constant 0 : index
    %c0_54 = arith.constant 0 : index
    %66 = vector.load %arg4[%c0_52, %c0_53, %c0_54] : memref<1x4x1xf32, #tpu.memory_space<vmem>>, vector<1x4x1xf32>
    %67 = vector.shape_cast %66 : vector<1x4x1xf32> to vector<4x1xf32>
    %68 = vector.shape_cast %61 : vector<4x1xf32> to vector<1x4x1xf32>
    tpu.vector_store %arg4[%c0_52, %c0_53, %c0_54], %68 {strides = array<i32>} : memref<1x4x1xf32, #tpu.memory_space<vmem>>, vector<1x4x1xf32>,
    %69 = arith.mulf %65, %65 : vector<4x288xf32>
    %cst_55 = arith.constant dense<0.000000e+00> : vector<4xf32>
    %70 = vector.multi_reduction <add>, %69, %cst_55 [1] : vector<4x288xf32> to vector<4xf32>
    %71 = vector.shape_cast %70 : vector<4xf32> to vector<4x1xf32>
    %c0_56 = arith.constant 0 : index
    %c0_57 = arith.constant 0 : index
    %c0_58 = arith.constant 0 : index
    %72 = vector.load %arg5[%c0_56, %c0_57, %c0_58] : memref<1x4x1xf32, #tpu.memory_space<vmem>>, vector<1x4x1xf32>
    %73 = vector.shape_cast %72 : vector<1x4x1xf32> to vector<4x1xf32>
    %74 = vector.shape_cast %71 : vector<4x1xf32> to vector<1x4x1xf32>
    tpu.vector_store %arg5[%c0_56, %c0_57, %c0_58], %74 {strides = array<i32>} : memref<1x4x1xf32, #tpu.memory_space<vmem>>, vector<1x4x1xf32>,
    return
  }
  func.func @transform_0(%arg0: i32) -> (i32, i32, i32) {
    %c0_i32 = arith.constant 0 : i32
    %c0_i32_0 = arith.constant 0 : i32
    %c0_i32_1 = arith.constant 0 : i32
    return %arg0, %c0_i32, %c0_i32_0 : i32, i32, i32
  }
  func.func @transform_1(%arg0: i32) -> (i32, i32, i32) {
    %c0_i32 = arith.constant 0 : i32
    %c0_i32_0 = arith.constant 0 : i32
    %c0_i32_1 = arith.constant 0 : i32
    %c0_i32_2 = arith.constant 0 : i32
    return %c0_i32, %c0_i32_0, %c0_i32_1 : i32, i32, i32
  }
  func.func @transform_2(%arg0: i32) -> (i32, i32) {
    %c0_i32 = arith.constant 0 : i32
    %c0_i32_0 = arith.constant 0 : i32
    %c0_i32_1 = arith.constant 0 : i32
    return %c0_i32, %c0_i32_0 : i32, i32
  }
  func.func @transform_3(%arg0: i32) -> (i32, i32, i32) {
    %c0_i32 = arith.constant 0 : i32
    %c0_i32_0 = arith.constant 0 : i32
    %c0_i32_1 = arith.constant 0 : i32
    return %arg0, %c0_i32, %c0_i32_0 : i32, i32, i32
  }
  func.func @transform_4(%arg0: i32) -> (i32, i32, i32) {
    %c0_i32 = arith.constant 0 : i32
    %c0_i32_0 = arith.constant 0 : i32
    %c0_i32_1 = arith.constant 0 : i32
    return %arg0, %c0_i32, %c0_i32_0 : i32, i32, i32
  }
}

module attributes {stable_mosaic.version = 11 : i64} {
  func.func @_attention_fused_kernel(%arg0: i32, %arg1: memref<1x16x384xf32, #tpu.memory_space<vmem>>, %arg2: memref<9x4x16xf32, #tpu.memory_space<vmem>>, %arg3: memref<9x4x1xf32, #tpu.memory_space<vmem>>, %arg4: memref<4x1xf32, #tpu.memory_space<vmem>>, %arg5: memref<4x1xf32, #tpu.memory_space<vmem>>, %arg6: memref<1x1xf32, #tpu.memory_space<smem>>, %arg7: memref<1x288xf32, #tpu.memory_space<vmem>>, %arg8: memref<1x16x288xf32, #tpu.memory_space<vmem>>, %arg9: memref<4x384xf32, #tpu.memory_space<vmem>>) attributes {dimension_semantics = [#tpu.dimension_semantics<parallel>], iteration_bounds = array<i64: 2>, scalar_prefetch = 0 : i64, scratch_operands = 1 : i64, tpu.core_type = #tpu.core_type<tc>, window_params = [{transform_indices = @transform_0, window_bounds = array<i64: 1, 16, 384>}, {pipeline_mode = #tpu.pipeline_mode<synchronous>, transform_indices = @transform_1, window_bounds = array<i64: 9, 4, 16>}, {pipeline_mode = #tpu.pipeline_mode<synchronous>, transform_indices = @transform_2, window_bounds = array<i64: 9, 4, 1>}, {pipeline_mode = #tpu.pipeline_mode<synchronous>, transform_indices = @transform_3, window_bounds = array<i64: 4, 1>}, {pipeline_mode = #tpu.pipeline_mode<synchronous>, transform_indices = @transform_4, window_bounds = array<i64: 4, 1>}, {transform_indices = @transform_5, window_bounds = array<i64: 1, 1>}, {pipeline_mode = #tpu.pipeline_mode<synchronous>, transform_indices = @transform_6, window_bounds = array<i64: 1, 288>}, {transform_indices = @transform_7, window_bounds = array<i64: 1, 16, 288>}]} {
    %cst = arith.constant 0.000000e+00 : f32
    %0 = vector.broadcast %cst : f32 to vector<4x288xf32>
    %c0 = arith.constant 0 : index
    %c0_0 = arith.constant 0 : index
    %c0_1 = arith.constant 0 : index
    %1 = vector.load %arg2[%c0, %c0_0, %c0_1] : memref<9x4x16xf32, #tpu.memory_space<vmem>>, vector<1x4x16xf32>
    %2 = vector.shape_cast %1 : vector<1x4x16xf32> to vector<4x16xf32>
    %c0_2 = arith.constant 0 : index
    %c0_3 = arith.constant 0 : index
    %c0_4 = arith.constant 0 : index
    %3 = vector.load %arg1[%c0_2, %c0_3, %c0_4] : memref<1x16x384xf32, #tpu.memory_space<vmem>>, vector<1x16x288xf32>
    %4 = vector.shape_cast %3 : vector<1x16x288xf32> to vector<16x288xf32>
    %cst_5 = arith.constant dense<0.000000e+00> : vector<4x288xf32>
    %5 = tpu.matmul %2, %4, %cst_5 {dimension_numbers = #tpu.dot_dimension_numbers<[1], [0], [0], [1], [0, 0, 1, 1], [], []>} : vector<4x16xf32>, vector<16x288xf32>, vector<4x288xf32> -> vector<4x288xf32>
    %6 = arith.addf %0, %5 : vector<4x288xf32>
    %c1 = arith.constant 1 : index
    %c0_6 = arith.constant 0 : index
    %c0_7 = arith.constant 0 : index
    %7 = vector.load %arg2[%c1, %c0_6, %c0_7] : memref<9x4x16xf32, #tpu.memory_space<vmem>>, vector<1x4x16xf32>
    %8 = vector.shape_cast %7 : vector<1x4x16xf32> to vector<4x16xf32>
    %c0_8 = arith.constant 0 : index
    %c0_9 = arith.constant 0 : index
    %c1_10 = arith.constant 1 : index
    %9 = vector.load %arg1[%c0_8, %c0_9, %c1_10] : memref<1x16x384xf32, #tpu.memory_space<vmem>>, vector<1x16x288xf32>
    %10 = vector.shape_cast %9 : vector<1x16x288xf32> to vector<16x288xf32>
    %cst_11 = arith.constant dense<0.000000e+00> : vector<4x288xf32>
    %11 = tpu.matmul %8, %10, %cst_11 {dimension_numbers = #tpu.dot_dimension_numbers<[1], [0], [0], [1], [0, 0, 1, 1], [], []>} : vector<4x16xf32>, vector<16x288xf32>, vector<4x288xf32> -> vector<4x288xf32>
    %12 = arith.addf %6, %11 : vector<4x288xf32>
    %c2 = arith.constant 2 : index
    %c0_12 = arith.constant 0 : index
    %c0_13 = arith.constant 0 : index
    %13 = vector.load %arg2[%c2, %c0_12, %c0_13] : memref<9x4x16xf32, #tpu.memory_space<vmem>>, vector<1x4x16xf32>
    %14 = vector.shape_cast %13 : vector<1x4x16xf32> to vector<4x16xf32>
    %c0_14 = arith.constant 0 : index
    %c0_15 = arith.constant 0 : index
    %c2_16 = arith.constant 2 : index
    %15 = vector.load %arg1[%c0_14, %c0_15, %c2_16] : memref<1x16x384xf32, #tpu.memory_space<vmem>>, vector<1x16x288xf32>
    %16 = vector.shape_cast %15 : vector<1x16x288xf32> to vector<16x288xf32>
    %cst_17 = arith.constant dense<0.000000e+00> : vector<4x288xf32>
    %17 = tpu.matmul %14, %16, %cst_17 {dimension_numbers = #tpu.dot_dimension_numbers<[1], [0], [0], [1], [0, 0, 1, 1], [], []>} : vector<4x16xf32>, vector<16x288xf32>, vector<4x288xf32> -> vector<4x288xf32>
    %18 = arith.addf %12, %17 : vector<4x288xf32>
    %c3 = arith.constant 3 : index
    %c0_18 = arith.constant 0 : index
    %c0_19 = arith.constant 0 : index
    %19 = vector.load %arg2[%c3, %c0_18, %c0_19] : memref<9x4x16xf32, #tpu.memory_space<vmem>>, vector<1x4x16xf32>
    %20 = vector.shape_cast %19 : vector<1x4x16xf32> to vector<4x16xf32>
    %c0_20 = arith.constant 0 : index
    %c0_21 = arith.constant 0 : index
    %c18 = arith.constant 18 : index
    %21 = vector.load %arg1[%c0_20, %c0_21, %c18] : memref<1x16x384xf32, #tpu.memory_space<vmem>>, vector<1x16x288xf32>
    %22 = vector.shape_cast %21 : vector<1x16x288xf32> to vector<16x288xf32>
    %cst_22 = arith.constant dense<0.000000e+00> : vector<4x288xf32>
    %23 = tpu.matmul %20, %22, %cst_22 {dimension_numbers = #tpu.dot_dimension_numbers<[1], [0], [0], [1], [0, 0, 1, 1], [], []>} : vector<4x16xf32>, vector<16x288xf32>, vector<4x288xf32> -> vector<4x288xf32>
    %24 = arith.addf %18, %23 : vector<4x288xf32>
    %c4 = arith.constant 4 : index
    %c0_23 = arith.constant 0 : index
    %c0_24 = arith.constant 0 : index
    %25 = vector.load %arg2[%c4, %c0_23, %c0_24] : memref<9x4x16xf32, #tpu.memory_space<vmem>>, vector<1x4x16xf32>
    %26 = vector.shape_cast %25 : vector<1x4x16xf32> to vector<4x16xf32>
    %c0_25 = arith.constant 0 : index
    %c0_26 = arith.constant 0 : index
    %c19 = arith.constant 19 : index
    %27 = vector.load %arg1[%c0_25, %c0_26, %c19] : memref<1x16x384xf32, #tpu.memory_space<vmem>>, vector<1x16x288xf32>
    %28 = vector.shape_cast %27 : vector<1x16x288xf32> to vector<16x288xf32>
    %cst_27 = arith.constant dense<0.000000e+00> : vector<4x288xf32>
    %29 = tpu.matmul %26, %28, %cst_27 {dimension_numbers = #tpu.dot_dimension_numbers<[1], [0], [0], [1], [0, 0, 1, 1], [], []>} : vector<4x16xf32>, vector<16x288xf32>, vector<4x288xf32> -> vector<4x288xf32>
    %30 = arith.addf %24, %29 : vector<4x288xf32>
    %c5 = arith.constant 5 : index
    %c0_28 = arith.constant 0 : index
    %c0_29 = arith.constant 0 : index
    %31 = vector.load %arg2[%c5, %c0_28, %c0_29] : memref<9x4x16xf32, #tpu.memory_space<vmem>>, vector<1x4x16xf32>
    %32 = vector.shape_cast %31 : vector<1x4x16xf32> to vector<4x16xf32>
    %c0_30 = arith.constant 0 : index
    %c0_31 = arith.constant 0 : index
    %c20 = arith.constant 20 : index
    %33 = vector.load %arg1[%c0_30, %c0_31, %c20] : memref<1x16x384xf32, #tpu.memory_space<vmem>>, vector<1x16x288xf32>
    %34 = vector.shape_cast %33 : vector<1x16x288xf32> to vector<16x288xf32>
    %cst_32 = arith.constant dense<0.000000e+00> : vector<4x288xf32>
    %35 = tpu.matmul %32, %34, %cst_32 {dimension_numbers = #tpu.dot_dimension_numbers<[1], [0], [0], [1], [0, 0, 1, 1], [], []>} : vector<4x16xf32>, vector<16x288xf32>, vector<4x288xf32> -> vector<4x288xf32>
    %36 = arith.addf %30, %35 : vector<4x288xf32>
    %c6 = arith.constant 6 : index
    %c0_33 = arith.constant 0 : index
    %c0_34 = arith.constant 0 : index
    %37 = vector.load %arg2[%c6, %c0_33, %c0_34] : memref<9x4x16xf32, #tpu.memory_space<vmem>>, vector<1x4x16xf32>
    %38 = vector.shape_cast %37 : vector<1x4x16xf32> to vector<4x16xf32>
    %c0_35 = arith.constant 0 : index
    %c0_36 = arith.constant 0 : index
    %c36 = arith.constant 36 : index
    %39 = vector.load %arg1[%c0_35, %c0_36, %c36] : memref<1x16x384xf32, #tpu.memory_space<vmem>>, vector<1x16x288xf32>
    %40 = vector.shape_cast %39 : vector<1x16x288xf32> to vector<16x288xf32>
    %cst_37 = arith.constant dense<0.000000e+00> : vector<4x288xf32>
    %41 = tpu.matmul %38, %40, %cst_37 {dimension_numbers = #tpu.dot_dimension_numbers<[1], [0], [0], [1], [0, 0, 1, 1], [], []>} : vector<4x16xf32>, vector<16x288xf32>, vector<4x288xf32> -> vector<4x288xf32>
    %42 = arith.addf %36, %41 : vector<4x288xf32>
    %c7 = arith.constant 7 : index
    %c0_38 = arith.constant 0 : index
    %c0_39 = arith.constant 0 : index
    %43 = vector.load %arg2[%c7, %c0_38, %c0_39] : memref<9x4x16xf32, #tpu.memory_space<vmem>>, vector<1x4x16xf32>
    %44 = vector.shape_cast %43 : vector<1x4x16xf32> to vector<4x16xf32>
    %c0_40 = arith.constant 0 : index
    %c0_41 = arith.constant 0 : index
    %c37 = arith.constant 37 : index
    %45 = vector.load %arg1[%c0_40, %c0_41, %c37] : memref<1x16x384xf32, #tpu.memory_space<vmem>>, vector<1x16x288xf32>
    %46 = vector.shape_cast %45 : vector<1x16x288xf32> to vector<16x288xf32>
    %cst_42 = arith.constant dense<0.000000e+00> : vector<4x288xf32>
    %47 = tpu.matmul %44, %46, %cst_42 {dimension_numbers = #tpu.dot_dimension_numbers<[1], [0], [0], [1], [0, 0, 1, 1], [], []>} : vector<4x16xf32>, vector<16x288xf32>, vector<4x288xf32> -> vector<4x288xf32>
    %48 = arith.addf %42, %47 : vector<4x288xf32>
    %c8 = arith.constant 8 : index
    %c0_43 = arith.constant 0 : index
    %c0_44 = arith.constant 0 : index
    %49 = vector.load %arg2[%c8, %c0_43, %c0_44] : memref<9x4x16xf32, #tpu.memory_space<vmem>>, vector<1x4x16xf32>
    %50 = vector.shape_cast %49 : vector<1x4x16xf32> to vector<4x16xf32>
    %c0_45 = arith.constant 0 : index
    %c0_46 = arith.constant 0 : index
    %c38 = arith.constant 38 : index
    %51 = vector.load %arg1[%c0_45, %c0_46, %c38] : memref<1x16x384xf32, #tpu.memory_space<vmem>>, vector<1x16x288xf32>
    %52 = vector.shape_cast %51 : vector<1x16x288xf32> to vector<16x288xf32>
    %cst_47 = arith.constant dense<0.000000e+00> : vector<4x288xf32>
    %53 = tpu.matmul %50, %52, %cst_47 {dimension_numbers = #tpu.dot_dimension_numbers<[1], [0], [0], [1], [0, 0, 1, 1], [], []>} : vector<4x16xf32>, vector<16x288xf32>, vector<4x288xf32> -> vector<4x288xf32>
    %54 = arith.addf %48, %53 : vector<4x288xf32>
    %c0_48 = arith.constant 0 : index
    %c0_49 = arith.constant 0 : index
    %55 = vector.load %arg4[%c0_48, %c0_49] : memref<4x1xf32, #tpu.memory_space<vmem>>, vector<4x1xf32>
    %56 = vector.broadcast %55 : vector<4x1xf32> to vector<4x288xf32>
    %57 = arith.mulf %54, %56 : vector<4x288xf32>
    %c0_50 = arith.constant 0 : index
    %c0_51 = arith.constant 0 : index
    %58 = vector.load %arg5[%c0_50, %c0_51] : memref<4x1xf32, #tpu.memory_space<vmem>>, vector<4x1xf32>
    %59 = vector.broadcast %58 : vector<4x1xf32> to vector<4x288xf32>
    %60 = arith.addf %57, %59 : vector<4x288xf32>
    %cst_52 = arith.constant 0.000000e+00 : f32
    %61 = vector.broadcast %cst_52 : f32 to vector<4x288xf32>
    %62 = arith.maximumf %60, %61 : vector<4x288xf32>
    %c0_53 = arith.constant 0 : index
    %c0_54 = arith.constant 0 : index
    %63 = vector.load %arg7[%c0_53, %c0_54] : memref<1x288xf32, #tpu.memory_space<vmem>>, vector<1x288xf32>
    %64 = vector.broadcast %63 : vector<1x288xf32> to vector<4x288xf32>
    %65 = arith.mulf %62, %64 : vector<4x288xf32>
    %cst_55 = arith.constant 0.000000e+00 : f32
    %66 = vector.broadcast %cst_55 : f32 to vector<4x384xf32>
    %c0_56 = arith.constant 0 : index
    %c0_57 = arith.constant 0 : index
    %67 = vector.load %arg9[%c0_56, %c0_57] : memref<4x384xf32, #tpu.memory_space<vmem>>, vector<4x384xf32>
    tpu.vector_store %arg9[%c0_56, %c0_57], %66 {strides = array<i32>} : memref<4x384xf32, #tpu.memory_space<vmem>>, vector<4x384xf32>,
    %c0_58 = arith.constant 0 : index
    %c19_59 = arith.constant 19 : index
    %68 = vector.load %arg9[%c0_58, %c19_59] : memref<4x384xf32, #tpu.memory_space<vmem>>, vector<4x288xf32>
    tpu.vector_store %arg9[%c0_58, %c19_59], %65 {strides = array<i32>} : memref<4x384xf32, #tpu.memory_space<vmem>>, vector<4x288xf32>,
    %cst_60 = arith.constant 0.000000e+00 : f32
    %69 = vector.broadcast %cst_60 : f32 to vector<4x288xf32>
    %c0_61 = arith.constant 0 : index
    %c0_62 = arith.constant 0 : index
    %c0_63 = arith.constant 0 : index
    %70 = vector.load %arg3[%c0_61, %c0_62, %c0_63] : memref<9x4x1xf32, #tpu.memory_space<vmem>>, vector<1x4x1xf32>
    %71 = vector.shape_cast %70 : vector<1x4x1xf32> to vector<4x1xf32>
    %c0_64 = arith.constant 0 : index
    %c0_65 = arith.constant 0 : index
    %72 = vector.load %arg9[%c0_64, %c0_65] : memref<4x384xf32, #tpu.memory_space<vmem>>, vector<4x288xf32>
    %73 = vector.broadcast %71 : vector<4x1xf32> to vector<4x288xf32>
    %74 = arith.mulf %73, %72 : vector<4x288xf32>
    %75 = arith.addf %69, %74 : vector<4x288xf32>
    %c1_66 = arith.constant 1 : index
    %c0_67 = arith.constant 0 : index
    %c0_68 = arith.constant 0 : index
    %76 = vector.load %arg3[%c1_66, %c0_67, %c0_68] : memref<9x4x1xf32, #tpu.memory_space<vmem>>, vector<1x4x1xf32>
    %77 = vector.shape_cast %76 : vector<1x4x1xf32> to vector<4x1xf32>
    %c0_69 = arith.constant 0 : index
    %c1_70 = arith.constant 1 : index
    %78 = vector.load %arg9[%c0_69, %c1_70] : memref<4x384xf32, #tpu.memory_space<vmem>>, vector<4x288xf32>
    %79 = vector.broadcast %77 : vector<4x1xf32> to vector<4x288xf32>
    %80 = arith.mulf %79, %78 : vector<4x288xf32>
    %81 = arith.addf %75, %80 : vector<4x288xf32>
    %c2_71 = arith.constant 2 : index
    %c0_72 = arith.constant 0 : index
    %c0_73 = arith.constant 0 : index
    %82 = vector.load %arg3[%c2_71, %c0_72, %c0_73] : memref<9x4x1xf32, #tpu.memory_space<vmem>>, vector<1x4x1xf32>
    %83 = vector.shape_cast %82 : vector<1x4x1xf32> to vector<4x1xf32>
    %c0_74 = arith.constant 0 : index
    %c2_75 = arith.constant 2 : index
    %84 = vector.load %arg9[%c0_74, %c2_75] : memref<4x384xf32, #tpu.memory_space<vmem>>, vector<4x288xf32>
    %85 = vector.broadcast %83 : vector<4x1xf32> to vector<4x288xf32>
    %86 = arith.mulf %85, %84 : vector<4x288xf32>
    %87 = arith.addf %81, %86 : vector<4x288xf32>
    %c3_76 = arith.constant 3 : index
    %c0_77 = arith.constant 0 : index
    %c0_78 = arith.constant 0 : index
    %88 = vector.load %arg3[%c3_76, %c0_77, %c0_78] : memref<9x4x1xf32, #tpu.memory_space<vmem>>, vector<1x4x1xf32>
    %89 = vector.shape_cast %88 : vector<1x4x1xf32> to vector<4x1xf32>
    %c0_79 = arith.constant 0 : index
    %c18_80 = arith.constant 18 : index
    %90 = vector.load %arg9[%c0_79, %c18_80] : memref<4x384xf32, #tpu.memory_space<vmem>>, vector<4x288xf32>
    %91 = vector.broadcast %89 : vector<4x1xf32> to vector<4x288xf32>
    %92 = arith.mulf %91, %90 : vector<4x288xf32>
    %93 = arith.addf %87, %92 : vector<4x288xf32>
    %c4_81 = arith.constant 4 : index
    %c0_82 = arith.constant 0 : index
    %c0_83 = arith.constant 0 : index
    %94 = vector.load %arg3[%c4_81, %c0_82, %c0_83] : memref<9x4x1xf32, #tpu.memory_space<vmem>>, vector<1x4x1xf32>
    %95 = vector.shape_cast %94 : vector<1x4x1xf32> to vector<4x1xf32>
    %c0_84 = arith.constant 0 : index
    %c19_85 = arith.constant 19 : index
    %96 = vector.load %arg9[%c0_84, %c19_85] : memref<4x384xf32, #tpu.memory_space<vmem>>, vector<4x288xf32>
    %97 = vector.broadcast %95 : vector<4x1xf32> to vector<4x288xf32>
    %98 = arith.mulf %97, %96 : vector<4x288xf32>
    %99 = arith.addf %93, %98 : vector<4x288xf32>
    %c5_86 = arith.constant 5 : index
    %c0_87 = arith.constant 0 : index
    %c0_88 = arith.constant 0 : index
    %100 = vector.load %arg3[%c5_86, %c0_87, %c0_88] : memref<9x4x1xf32, #tpu.memory_space<vmem>>, vector<1x4x1xf32>
    %101 = vector.shape_cast %100 : vector<1x4x1xf32> to vector<4x1xf32>
    %c0_89 = arith.constant 0 : index
    %c20_90 = arith.constant 20 : index
    %102 = vector.load %arg9[%c0_89, %c20_90] : memref<4x384xf32, #tpu.memory_space<vmem>>, vector<4x288xf32>
    %103 = vector.broadcast %101 : vector<4x1xf32> to vector<4x288xf32>
    %104 = arith.mulf %103, %102 : vector<4x288xf32>
    %105 = arith.addf %99, %104 : vector<4x288xf32>
    %c6_91 = arith.constant 6 : index
    %c0_92 = arith.constant 0 : index
    %c0_93 = arith.constant 0 : index
    %106 = vector.load %arg3[%c6_91, %c0_92, %c0_93] : memref<9x4x1xf32, #tpu.memory_space<vmem>>, vector<1x4x1xf32>
    %107 = vector.shape_cast %106 : vector<1x4x1xf32> to vector<4x1xf32>
    %c0_94 = arith.constant 0 : index
    %c36_95 = arith.constant 36 : index
    %108 = vector.load %arg9[%c0_94, %c36_95] : memref<4x384xf32, #tpu.memory_space<vmem>>, vector<4x288xf32>
    %109 = vector.broadcast %107 : vector<4x1xf32> to vector<4x288xf32>
    %110 = arith.mulf %109, %108 : vector<4x288xf32>
    %111 = arith.addf %105, %110 : vector<4x288xf32>
    %c7_96 = arith.constant 7 : index
    %c0_97 = arith.constant 0 : index
    %c0_98 = arith.constant 0 : index
    %112 = vector.load %arg3[%c7_96, %c0_97, %c0_98] : memref<9x4x1xf32, #tpu.memory_space<vmem>>, vector<1x4x1xf32>
    %113 = vector.shape_cast %112 : vector<1x4x1xf32> to vector<4x1xf32>
    %c0_99 = arith.constant 0 : index
    %c37_100 = arith.constant 37 : index
    %114 = vector.load %arg9[%c0_99, %c37_100] : memref<4x384xf32, #tpu.memory_space<vmem>>, vector<4x288xf32>
    %115 = vector.broadcast %113 : vector<4x1xf32> to vector<4x288xf32>
    %116 = arith.mulf %115, %114 : vector<4x288xf32>
    %117 = arith.addf %111, %116 : vector<4x288xf32>
    %c8_101 = arith.constant 8 : index
    %c0_102 = arith.constant 0 : index
    %c0_103 = arith.constant 0 : index
    %118 = vector.load %arg3[%c8_101, %c0_102, %c0_103] : memref<9x4x1xf32, #tpu.memory_space<vmem>>, vector<1x4x1xf32>
    %119 = vector.shape_cast %118 : vector<1x4x1xf32> to vector<4x1xf32>
    %c0_104 = arith.constant 0 : index
    %c38_105 = arith.constant 38 : index
    %120 = vector.load %arg9[%c0_104, %c38_105] : memref<4x384xf32, #tpu.memory_space<vmem>>, vector<4x288xf32>
    %121 = vector.broadcast %119 : vector<4x1xf32> to vector<4x288xf32>
    %122 = arith.mulf %121, %120 : vector<4x288xf32>
    %123 = arith.addf %117, %122 : vector<4x288xf32>
    %cst_106 = arith.constant dense<0.000000e+00> : vector<288xf32>
    %124 = vector.multi_reduction <add>, %123, %cst_106 [0] : vector<4x288xf32> to vector<288xf32>
    %125 = vector.shape_cast %124 : vector<288xf32> to vector<1x288xf32>
    %c0_107 = arith.constant 0 : index
    %c0_108 = arith.constant 0 : index
    %126 = memref.load %arg6[%c0_107, %c0_108] : memref<1x1xf32, #tpu.memory_space<smem>>
    %127 = vector.broadcast %126 : f32 to vector<1x288xf32>
    %128 = arith.addf %125, %127 : vector<1x288xf32>
    %c0_109 = arith.constant 0 : index
    %c0_110 = arith.constant 0 : index
    %c19_111 = arith.constant 19 : index
    %129 = vector.load %arg1[%c0_109, %c0_110, %c19_111] : memref<1x16x384xf32, #tpu.memory_space<vmem>>, vector<1x16x288xf32>
    %130 = vector.shape_cast %129 : vector<1x16x288xf32> to vector<16x288xf32>
    %131 = vector.broadcast %128 : vector<1x288xf32> to vector<16x288xf32>
    %132 = arith.mulf %131, %130 : vector<16x288xf32>
    %133 = arith.negf %132 : vector<16x288xf32>
    %134 = math.exp %133 : vector<16x288xf32>
    %cst_112 = arith.constant 1.000000e+00 : f32
    %135 = vector.broadcast %cst_112 : f32 to vector<16x288xf32>
    %136 = arith.addf %135, %134 : vector<16x288xf32>
    %137 = arith.divf %135, %136 : vector<16x288xf32>
    %c0_113 = arith.constant 0 : index
    %c0_114 = arith.constant 0 : index
    %c0_115 = arith.constant 0 : index
    %138 = vector.load %arg8[%c0_113, %c0_114, %c0_115] : memref<1x16x288xf32, #tpu.memory_space<vmem>>, vector<1x16x288xf32>
    %139 = vector.shape_cast %138 : vector<1x16x288xf32> to vector<16x288xf32>
    %140 = vector.shape_cast %137 : vector<16x288xf32> to vector<1x16x288xf32>
    tpu.vector_store %arg8[%c0_113, %c0_114, %c0_115], %140 {strides = array<i32>} : memref<1x16x288xf32, #tpu.memory_space<vmem>>, vector<1x16x288xf32>,
    return
  }
  func.func @transform_0(%arg0: i32) -> (i32, i32, i32) {
    %c0_i32 = arith.constant 0 : i32
    %c0_i32_0 = arith.constant 0 : i32
    %c0_i32_1 = arith.constant 0 : i32
    return %arg0, %c0_i32, %c0_i32_0 : i32, i32, i32
  }
  func.func @transform_1(%arg0: i32) -> (i32, i32, i32) {
    %c0_i32 = arith.constant 0 : i32
    %c0_i32_0 = arith.constant 0 : i32
    %c0_i32_1 = arith.constant 0 : i32
    %c0_i32_2 = arith.constant 0 : i32
    return %c0_i32, %c0_i32_0, %c0_i32_1 : i32, i32, i32
  }
  func.func @transform_2(%arg0: i32) -> (i32, i32, i32) {
    %c0_i32 = arith.constant 0 : i32
    %c0_i32_0 = arith.constant 0 : i32
    %c0_i32_1 = arith.constant 0 : i32
    %c0_i32_2 = arith.constant 0 : i32
    return %c0_i32, %c0_i32_0, %c0_i32_1 : i32, i32, i32
  }
  func.func @transform_3(%arg0: i32) -> (i32, i32) {
    %c0_i32 = arith.constant 0 : i32
    %c0_i32_0 = arith.constant 0 : i32
    %c0_i32_1 = arith.constant 0 : i32
    return %c0_i32, %c0_i32_0 : i32, i32
  }
  func.func @transform_4(%arg0: i32) -> (i32, i32) {
    %c0_i32 = arith.constant 0 : i32
    %c0_i32_0 = arith.constant 0 : i32
    %c0_i32_1 = arith.constant 0 : i32
    return %c0_i32, %c0_i32_0 : i32, i32
  }
  func.func @transform_5(%arg0: i32) -> (i32, i32) {
    %c0_i32 = arith.constant 0 : i32
    %c0_i32_0 = arith.constant 0 : i32
    %c0_i32_1 = arith.constant 0 : i32
    return %c0_i32, %c0_i32_0 : i32, i32
  }
  func.func @transform_6(%arg0: i32) -> (i32, i32) {
    %c0_i32 = arith.constant 0 : i32
    %c0_i32_0 = arith.constant 0 : i32
    %c0_i32_1 = arith.constant 0 : i32
    return %c0_i32, %c0_i32_0 : i32, i32
  }
  func.func @transform_7(%arg0: i32) -> (i32, i32, i32) {
    %c0_i32 = arith.constant 0 : i32
    %c0_i32_0 = arith.constant 0 : i32
    %c0_i32_1 = arith.constant 0 : i32
    return %arg0, %c0_i32, %c0_i32_0 : i32, i32, i32
  }
}

</mosaic_0001>

<bundles_post_ra>
// kernel: attention_block_forward.2
= control target key start
LH: loop header
LB: loop body
LE: loop exit
PB: predicated region body
PF: predicated region fallthrough
CT: control target
= control target key end

     0   :  { %s2059_s15 = smov 0   ;;  %s2278_s0 = inlined_call_operand.vmem [shape: f32[2,16,384], index: 0, kind: input, shape index: {}]   ;;  %s2279_s1 = inlined_call_operand.vmem [shape: f32[9,4,16], index: 1, kind: input, shape index: {}]   ;;  %s2280_s2 = inlined_call_operand.vmem [shape: f32[1,288], index: 2, kind: input, shape index: {}]   ;;  %s2281_s3 = inlined_call_operand.vmem [shape: f32[2,4,1], index: 3, kind: output, shape index: {0}]   ;;  %s2282_s4 = inlined_call_operand.vmem [shape: f32[2,4,1], index: 4, kind: output, shape index: {1}]  }
   0x1 LB: > { %s1871_s16 = sadd.s32 4294967295, %s2022_s15   ;;  %p1875_p0 = scmp.ge.s32.totalorder %s2022_s15, 1  ;;  %s2022_s15 = sphi %s2059_s15, %s15_s15  }
   0x2   : > { %p165_p1 = scmp.lt.s32.totalorder %s2022_s15, 3 }
   0x4   : > { %p166_p2 = pnand %p1875_p0, %p165_p1 }
   0x5   : > { %p194_p3 = scmp.lt.s32.totalorder (!%p166_p2), %s1871_s16, 1  ;;  %s2026_s21 = smov (!%p166_p2), 127  }
   0x6   : > { %169 = sbr.rel (%p166_p2) target bundleno = 720 (0x2d0), region = 32  ;;  %s2027_s22 = smov (!%p166_p2), 126  }
   0x7   : > { %s2028_s23 = smov (!%p166_p2), 110   ;;  %s2029_s24 = smov (!%p166_p2), 109  }
   0x8   : > { %s2030_s25 = smov (!%p166_p2), 108   ;;  %s2031_s26 = smov (!%p166_p2), 92  }
   0x9   : > { %s2032_s27 = smov (!%p166_p2), 91   ;;  %s2033_s28 = smov (!%p166_p2), 90  }
   0xb   : > { %v2024_v0 = vmov 0.0   ;;  %s2284_s16 = smov (!%p194_p3, %s1871_s16), 1  ;;  %vm2025_vm0 = vmmov 0   ;;  %vm234_vm1 = vcmask 1039360   ;;  %v1879_v15 = vld [vmem:[%s2279_s1 + $0x4] sm:$0xf] }
   0xc   : > { %1934 = vmatprep.subr.mxu1 %v2024_v0  ;;  %313 = vmatprep.mubr.f32.mxu0 %v2024_v0  ;;  %s1997_s17 = smul.u32 48, %s2284_s16  ;;  %vm245_vm2 = vcmask 130048   ;;  %vm548_vm3 = vcmask 1031168   ;;  %v207_v20 = vld [vmem:[%s2279_s1] sm:$0xf]  ;;  %vm720_vm4 = vcmask 900096  }
   0xd   : > { %1938 = vmatprep.mubr.msk.f32.mxu1 %vm2025_vm0, %v2024_v0  ;;  %v1884_v27 = vld [vmem:[%s2279_s1 + $0x8] sm:$0xf]  ;;  %v1887_v38 = vld [vmem:[%s2279_s1 + $0xc] sm:$0xf]  ;;  %vm892_vm5 = vcmask 891904   ;;  %vm1064_vm6 = vcmask 883712  }
   0xe   : > { %s198_s20 = scalar_lea.vmem %s2278_s0, %s1997_s17  ;;  %v1890_v49 = vld [vmem:[%s2279_s1 + $0x10] sm:$0xf]  ;;  %v1893_v60 = vld [vmem:[%s2279_s1 + $0x14] sm:$0xf]  ;;  %vm1236_vm7 = vcmask 752640   ;;  %vm1408_vm8 = vcmask 744448  }
   0xf   : > { %v2077_v1 = vld [vmem:[%s198_s20 + $0x20] sm:$0xff]  ;;  %v2079_v2 = vld [vmem:[%s198_s20 + $0x18] sm:$0xff]  ;;  %v2083_v3 = vld [vmem:[%s198_s20 + $0x28] sm:$0xff]  ;;  %vm1580_vm9 = vcmask 736256   ;;  %vm1758_vm10 = vcmask 1043456   ;;  %vm1762_vm11 = vcmask 257024  }
  0x10   : > { %230 = vrot.lane.b32.xlu0 %v2077_v1, %s2026_s21  ;;  %228 = vrot.lane.b32.xlu1 %v2079_v2, %s2026_s21  ;;  %v2085_v4 = vld [vmem:[%s198_s20 + $0x8] sm:$0xff]  ;;  %v2089_v5 = vld [vmem:[%s198_s20 + $0x10] sm:$0xff]  ;;  %vm1774_vm12 = vcmask 3072  }
  0x11   : > { %v2091_v6 = vld [vmem:[%s198_s20] sm:$0xff] }
  0x14   : > { %232 = vrot.lane.b32.xlu0 %v2083_v3, %s2026_s21  ;;  %224 = vrot.lane.b32.xlu1 %v2085_v4, %s2026_s21 }
  0x18   : > { %226 = vrot.lane.b32.xlu0 %v2089_v5, %s2026_s21  ;;  %222 = vrot.lane.b32.xlu1 %v2091_v6, %s2026_s21 }
  0x1c   : > { %544 = vrot.lane.b32.xlu0 %v2077_v1, %s2027_s22  ;;  %546 = vrot.lane.b32.xlu1 %v2083_v3, %s2027_s22 }
  0x20   : > { %542 = vrot.lane.b32.xlu0 %v2079_v2, %s2027_s22  ;;  %538 = vrot.lane.b32.xlu1 %v2085_v4, %s2027_s22 }
  0x24   : > { %540 = vrot.lane.b32.xlu0 %v2089_v5, %s2027_s22  ;;  %536 = vrot.lane.b32.xlu1 %v2091_v6, %s2027_s22 }
  0x28   : > { %716 = vrot.lane.b32.xlu0 %v2077_v1, %s2028_s23  ;;  %718 = vrot.lane.b32.xlu1 %v2083_v3, %s2028_s23 }
  0x2c   : > { %714 = vrot.lane.b32.xlu0 %v2079_v2, %s2028_s23  ;;  %710 = vrot.lane.b32.xlu1 %v2085_v4, %s2028_s23 }
  0x30   : > { %712 = vrot.lane.b32.xlu0 %v2089_v5, %s2028_s23  ;;  %708 = vrot.lane.b32.xlu1 %v2091_v6, %s2028_s23 }
  0x34   : > { %888 = vrot.lane.b32.xlu0 %v2077_v1, %s2029_s24  ;;  %890 = vrot.lane.b32.xlu1 %v2083_v3, %s2029_s24 }
  0x38   : > { %886 = vrot.lane.b32.xlu0 %v2079_v2, %s2029_s24  ;;  %882 = vrot.lane.b32.xlu1 %v2085_v4, %s2029_s24 }
  0x3c   : > { %884 = vrot.lane.b32.xlu0 %v2089_v5, %s2029_s24  ;;  %880 = vrot.lane.b32.xlu1 %v2091_v6, %s2029_s24 }
  0x40   : > { %1060 = vrot.lane.b32.xlu0 %v2077_v1, %s2030_s25  ;;  %1062 = vrot.lane.b32.xlu1 %v2083_v3, %s2030_s25 }
  0x44   : > { %1058 = vrot.lane.b32.xlu0 %v2079_v2, %s2030_s25  ;;  %1054 = vrot.lane.b32.xlu1 %v2085_v4, %s2030_s25 }
  0x48   : > { %1056 = vrot.lane.b32.xlu0 %v2089_v5, %s2030_s25  ;;  %1052 = vrot.lane.b32.xlu1 %v2091_v6, %s2030_s25  ;;  %s1877_s25 = sshll.u32 %s2284_s16, 2 }
  0x49   : > { %s206_s30 = scalar_lea.vmem %s2282_s4, %s1877_s25 }
  0x4c   : > { %1232 = vrot.lane.b32.xlu0 %v2077_v1, %s2031_s26  ;;  %1234 = vrot.lane.b32.xlu1 %v2083_v3, %s2031_s26 }
  0x50   : > { %1230 = vrot.lane.b32.xlu0 %v2079_v2, %s2031_s26  ;;  %1226 = vrot.lane.b32.xlu1 %v2085_v4, %s2031_s26 }
  0x54   : > { %1228 = vrot.lane.b32.xlu0 %v2089_v5, %s2031_s26  ;;  %1224 = vrot.lane.b32.xlu1 %v2091_v6, %s2031_s26 }
  0x58   : > { %1404 = vrot.lane.b32.xlu0 %v2077_v1, %s2032_s27  ;;  %1406 = vrot.lane.b32.xlu1 %v2083_v3, %s2032_s27 }
  0x5c   : > { %1402 = vrot.lane.b32.xlu0 %v2079_v2, %s2032_s27  ;;  %1398 = vrot.lane.b32.xlu1 %v2085_v4, %s2032_s27 }
  0x60   : > { %1400 = vrot.lane.b32.xlu0 %v2089_v5, %s2032_s27  ;;  %1396 = vrot.lane.b32.xlu1 %v2091_v6, %s2032_s27 }
  0x64   : > { %1576 = vrot.lane.b32.xlu0 %v2077_v1, %s2033_s28  ;;  %1578 = vrot.lane.b32.xlu1 %v2083_v3, %s2033_s28 }
  0x68   : > { %1574 = vrot.lane.b32.xlu0 %v2079_v2, %s2033_s28  ;;  %1570 = vrot.lane.b32.xlu1 %v2085_v4, %s2033_s28 }
  0x6c   : > { %1572 = vrot.lane.b32.xlu0 %v2089_v5, %s2033_s28  ;;  %1568 = vrot.lane.b32.xlu1 %v2091_v6, %s2033_s28  ;;  %s202_s28 = scalar_lea.vmem %s2281_s3, %s1877_s25 }
  0x82   : > { %v231_v7 = vpop.permute.xlu0 %230  ;;  %v229_v8 = vpop.permute.xlu1 %228 }
  0x83   : > { %v237_v12 = vsel %vm234_vm1, %v229_v8, %v231_v7 }
  0x86   : > { %v233_v9 = vpop.permute.xlu0 %232  ;;  %v225_v10 = vpop.permute.xlu1 %224 }
  0x87   : > { %1935 = vmatpush3.msra.mxu1 %v233_v9  ;;  %v238_v11 = vsel %vm234_vm1, %v231_v7, %v233_v9 }
  0x88   : > { %277 = vmatprep.subr.mxu0 %v238_v11  ;;  %1936 = vmatprep.subr.mxu1 %v2024_v0 }
  0x89   : > { %278 = vmatpush1.msra.mxu0 %v237_v12 }
  0x8a   : > { %v227_v13 = vpop.permute.xlu0 %226  ;;  %v223_v14 = vpop.permute.xlu1 %222 }
  0x8b   : > { %1937 = vmatpush3.msra.mxu1 %v227_v13  ;;  %v236_v16 = vsel %vm234_vm1, %v225_v10, %v227_v13  ;;  %v235_v17 = vsel %vm234_vm1, %v223_v14, %v225_v10  ;;  %v1896_v10 = vld [vmem:[%s2279_s1 + $0x18] sm:$0xf] }
  0x8c   : > { %279 = vmatprep.subr.mxu0 %v236_v16  ;;  %1941 = vmatprep.subr.mxu1 %v2024_v0 }
  0x8d   : > { %280 = vmatpush1.msra.mxu0 %v235_v17  ;;  %1939 = vmatmul.mubr.msk.f32.vlgmr.msra.gmra.mxu1 %vm245_vm2, %v1879_v15  ;;  %v1899_v17 = vld [vmem:[%s2279_s1 + $0x1c] sm:$0xf] }
  0x8e   : > { %1942 = vmatpush3.msra.mxu1 %v2083_v3  ;;  %v545_v18 = vpop.permute.xlu0 %544  ;;  %421 = vmatprep.subr.mxu0 %v2077_v1  ;;  %v547_v19 = vpop.permute.xlu1 %546 }
  0x8f   : > { %1943 = vmatprep.subr.mxu1 %v2024_v0  ;;  %1880 = vmatmul.mubr.msk.f32.vlgmr.msra.gmra.mxu0 %vm245_vm2, %v1879_v15  ;;  %v552_v22 = vsel %vm548_vm3, %v545_v18, %v547_v19 }
  0x90   : > { %422 = vmatpush1.msra.mxu0 %v2079_v2  ;;  %1944 = vmatpush3.msra.mxu1 %v2089_v5 }
  0x91   : > { %423 = vmatprep.subr.mxu0 %v2085_v4  ;;  %1945 = vmatprep.mubr.msk.f32.mxu1 %vm2025_vm0, %v2024_v0 }
  0x92   : > { %1948 = vmatprep.subr.mxu1 %v2024_v0  ;;  %424 = vmatpush1.msra.mxu0 %v2091_v6  ;;  %v543_v21 = vpop.permute.xlu0 %542  ;;  %v539_v23 = vpop.permute.xlu1 %538 }
  0x93   : > { %1946 = vmatmul.mubr.msk.f32.vlgmr.msra.gmra.mxu1 %vm245_vm2, %v207_v20  ;;  %v551_v24 = vsel %vm548_vm3, %v543_v21, %v545_v18  ;;  %590 = vmatprep.subr.mxu0 %v552_v22 }
  0x94   : > { %1949 = vmatpush3.msra.mxu1 %v547_v19  ;;  %457 = vmatprep.mubr.f32.mxu0 %v2024_v0 }
  0x95   : > { %1882 = vmatmul.mubr.msk.f32.vlgmr.msra.gmra.mxu0 %vm245_vm2, %v207_v20  ;;  %1950 = vmatprep.subr.mxu1 %v2024_v0 }
  0x96   : > { %591 = vmatpush1.msra.mxu0 %v551_v24  ;;  %v541_v25 = vpop.permute.xlu0 %540  ;;  %v537_v26 = vpop.permute.xlu1 %536  ;;  %1952 = vmatprep.mubr.msk.f32.mxu1 %vm2025_vm0, %v2024_v0 }
  0x97   : > { %v549_v28 = vsel %vm548_vm3, %v537_v26, %v539_v23  ;;  %1951 = vmatpush3.msra.mxu1 %v541_v25  ;;  %v550_v29 = vsel %vm548_vm3, %v539_v23, %v541_v25  ;;  %626 = vmatprep.mubr.f32.mxu0 %v2024_v0 }
  0x98   : > { %592 = vmatprep.subr.mxu0 %v550_v29  ;;  %1955 = vmatprep.subr.mxu1 %v2024_v0 }
  0x99   : > { %593 = vmatpush1.msra.mxu0 %v549_v28  ;;  %1953 = vmatmul.mubr.msk.f32.vlgmr.msra.gmra.mxu1 %vm245_vm2, %v1884_v27  ;;  %v1902_v28 = vld [vmem:[%s2279_s1 + $0x20] sm:$0xf] }
  0x9a   : > { %v717_v30 = vpop.permute.xlu0 %716  ;;  %v719_v31 = vpop.permute.xlu1 %718  ;;  %1885 = vmatmul.mubr.msk.f32.vlgmr.msra.gmra.mxu0 %vm245_vm2, %v1884_v27  ;;  %1959 = vmatprep.mubr.msk.f32.mxu1 %vm2025_vm0, %v2024_v0 }
  0x9b   : > { %v724_v32 = vsel %vm720_vm4, %v717_v30, %v719_v31  ;;  %1956 = vmatpush3.msra.mxu1 %v719_v31  ;;  %798 = vmatprep.mubr.f32.mxu0 %v2024_v0 }
  0x9c   : > { %762 = vmatprep.subr.mxu0 %v724_v32  ;;  %1957 = vmatprep.subr.mxu1 %v2024_v0 }
  0x9e   : > { %v715_v33 = vpop.permute.xlu0 %714  ;;  %v711_v34 = vpop.permute.xlu1 %710 }
  0x9f   : > { %v723_v35 = vsel %vm720_vm4, %v715_v33, %v717_v30 }
  0xa0   : > { %763 = vmatpush1.msra.mxu0 %v723_v35 }
  0xa2   : > { %v713_v36 = vpop.permute.xlu0 %712  ;;  %v709_v37 = vpop.permute.xlu1 %708 }
  0xa3   : > { %v721_v39 = vsel %vm720_vm4, %v709_v37, %v711_v34  ;;  %1958 = vmatpush3.msra.mxu1 %v713_v36  ;;  %v722_v40 = vsel %vm720_vm4, %v711_v34, %v713_v36 }
  0xa4   : > { %764 = vmatprep.subr.mxu0 %v722_v40  ;;  %1962 = vmatprep.subr.mxu1 %v2024_v0 }
  0xa5   : > { %765 = vmatpush1.msra.mxu0 %v721_v39  ;;  %1960 = vmatmul.mubr.msk.f32.vlgmr.msra.gmra.mxu1 %vm245_vm2, %v1887_v38 }
  0xa6   : > { %v889_v41 = vpop.permute.xlu0 %888  ;;  %v891_v42 = vpop.permute.xlu1 %890  ;;  %1888 = vmatmul.mubr.msk.f32.vlgmr.msra.gmra.mxu0 %vm245_vm2, %v1887_v38  ;;  %1966 = vmatprep.mubr.msk.f32.mxu1 %vm2025_vm0, %v2024_v0 }
  0xa7   : > { %v896_v43 = vsel %vm892_vm5, %v889_v41, %v891_v42  ;;  %1963 = vmatpush3.msra.mxu1 %v891_v42  ;;  %970 = vmatprep.mubr.f32.mxu0 %v2024_v0 }
  0xa8   : > { %934 = vmatprep.subr.mxu0 %v896_v43  ;;  %1964 = vmatprep.subr.mxu1 %v2024_v0 }
  0xaa   : > { %v887_v44 = vpop.permute.xlu0 %886  ;;  %v883_v45 = vpop.permute.xlu1 %882 }
  0xab   : > { %v895_v46 = vsel %vm892_vm5, %v887_v44, %v889_v41 }
  0xac   : > { %935 = vmatpush1.msra.mxu0 %v895_v46 }
  0xae   : > { %v885_v47 = vpop.permute.xlu0 %884  ;;  %v881_v48 = vpop.permute.xlu1 %880 }
  0xaf   : > { %v893_v50 = vsel %vm892_vm5, %v881_v48, %v883_v45  ;;  %1965 = vmatpush3.msra.mxu1 %v885_v47  ;;  %v894_v51 = vsel %vm892_vm5, %v883_v45, %v885_v47 }
  0xb0   : > { %936 = vmatprep.subr.mxu0 %v894_v51  ;;  %1969 = vmatprep.subr.mxu1 %v2024_v0 }
  0xb1   : > { %937 = vmatpush1.msra.mxu0 %v893_v50  ;;  %1967 = vmatmul.mubr.msk.f32.vlgmr.msra.gmra.mxu1 %vm245_vm2, %v1890_v49 }
  0xb2   : > { %v1061_v52 = vpop.permute.xlu0 %1060  ;;  %v1063_v53 = vpop.permute.xlu1 %1062  ;;  %1891 = vmatmul.mubr.msk.f32.vlgmr.msra.gmra.mxu0 %vm245_vm2, %v1890_v49  ;;  %1973 = vmatprep.mubr.msk.f32.mxu1 %vm2025_vm0, %v2024_v0 }
  0xb3   : > { %v1068_v54 = vsel %vm1064_vm6, %v1061_v52, %v1063_v53  ;;  %1970 = vmatpush3.msra.mxu1 %v1063_v53  ;;  %1142 = vmatprep.mubr.f32.mxu0 %v2024_v0 }
  0xb4   : > { %1106 = vmatprep.subr.mxu0 %v1068_v54  ;;  %1971 = vmatprep.subr.mxu1 %v2024_v0 }
  0xb6   : > { %v1059_v55 = vpop.permute.xlu0 %1058  ;;  %v1055_v56 = vpop.permute.xlu1 %1054 }
  0xb7   : > { %v1067_v57 = vsel %vm1064_vm6, %v1059_v55, %v1061_v52 }
  0xb8   : > { %1107 = vmatpush1.msra.mxu0 %v1067_v57 }
  0xba   : > { %v1057_v58 = vpop.permute.xlu0 %1056  ;;  %v1053_v59 = vpop.permute.xlu1 %1052 }
  0xbb   : > { %v1065_v61 = vsel %vm1064_vm6, %v1053_v59, %v1055_v56  ;;  %1972 = vmatpush3.msra.mxu1 %v1057_v58  ;;  %v1066_v62 = vsel %vm1064_vm6, %v1055_v56, %v1057_v58 }
  0xbc   : > { %1108 = vmatprep.subr.mxu0 %v1066_v62  ;;  %1976 = vmatprep.subr.mxu1 %v2024_v0 }
  0xbd   : > { %1109 = vmatpush1.msra.mxu0 %v1065_v61  ;;  %1974 = vmatmul.mubr.msk.f32.vlgmr.msra.gmra.mxu1 %vm245_vm2, %v1893_v60 }
  0xbe   : > { %v1233_v63 = vpop.permute.xlu0 %1232  ;;  %v1235_v1 = vpop.permute.xlu1 %1234  ;;  %1894 = vmatmul.mubr.msk.f32.vlgmr.msra.gmra.mxu0 %vm245_vm2, %v1893_v60  ;;  %1980 = vmatprep.mubr.msk.f32.mxu1 %vm2025_vm0, %v2024_v0 }
  0xbf   : > { %v1240_v2 = vsel %vm1236_vm7, %v1233_v63, %v1235_v1  ;;  %1977 = vmatpush3.msra.mxu1 %v1235_v1  ;;  %1314 = vmatprep.mubr.f32.mxu0 %v2024_v0 }
  0xc0   : > { %1278 = vmatprep.subr.mxu0 %v1240_v2  ;;  %1978 = vmatprep.subr.mxu1 %v2024_v0 }
  0xc2   : > { %v1231_v3 = vpop.permute.xlu0 %1230  ;;  %v1227_v4 = vpop.permute.xlu1 %1226 }
  0xc3   : > { %v1239_v5 = vsel %vm1236_vm7, %v1231_v3, %v1233_v63 }
  0xc4   : > { %1279 = vmatpush1.msra.mxu0 %v1239_v5 }
  0xc6   : > { %v1229_v6 = vpop.permute.xlu0 %1228  ;;  %v1225_v7 = vpop.permute.xlu1 %1224 }
  0xc7   : > { %v1237_v8 = vsel %vm1236_vm7, %v1225_v7, %v1227_v4  ;;  %1979 = vmatpush3.msra.mxu1 %v1229_v6  ;;  %v1238_v9 = vsel %vm1236_vm7, %v1227_v4, %v1229_v6  ;;  %v1740_v7 = vlaneseq }
  0xc8   : > { %1280 = vmatprep.subr.mxu0 %v1238_v9  ;;  %1983 = vmatprep.subr.mxu1 %v2024_v0 }
  0xc9   : > { %1281 = vmatpush1.msra.mxu0 %v1237_v8  ;;  %1981 = vmatmul.mubr.msk.f32.vlgmr.msra.gmra.mxu1 %vm245_vm2, %v1896_v10 }
  0xca   : > { %v1405_v11 = vpop.permute.xlu0 %1404  ;;  %v1407_v12 = vpop.permute.xlu1 %1406  ;;  %1897 = vmatmul.mubr.msk.f32.vlgmr.msra.gmra.mxu0 %vm245_vm2, %v1896_v10  ;;  %1987 = vmatprep.mubr.msk.f32.mxu1 %vm2025_vm0, %v2024_v0 }
  0xcb   : > { %v1412_v13 = vsel %vm1408_vm8, %v1405_v11, %v1407_v12  ;;  %1984 = vmatpush3.msra.mxu1 %v1407_v12  ;;  %1486 = vmatprep.mubr.f32.mxu0 %v2024_v0  ;;  %v1741_v12 = vshrl.u32 %v1740_v7, 7 }
  0xcc   : > { %1450 = vmatprep.subr.mxu0 %v1412_v13  ;;  %1985 = vmatprep.subr.mxu1 %v2024_v0 }
  0xce   : > { %v1403_v14 = vpop.permute.xlu0 %1402  ;;  %v1399_v15 = vpop.permute.xlu1 %1398 }
  0xcf   : > { %v1411_v16 = vsel %vm1408_vm8, %v1403_v14, %v1405_v11 }
  0xd0   : > { %1451 = vmatpush1.msra.mxu0 %v1411_v16 }
  0xd2   : > { %v1401_v18 = vpop.permute.xlu0 %1400  ;;  %v1397_v19 = vpop.permute.xlu1 %1396 }
  0xd3   : > { %v1409_v20 = vsel %vm1408_vm8, %v1397_v19, %v1399_v15  ;;  %1986 = vmatpush3.msra.mxu1 %v1401_v18  ;;  %v1410_v21 = vsel %vm1408_vm8, %v1399_v15, %v1401_v18  ;;  %v1750_v18 = vsub.s32 2, %v1741_v12 }
  0xd4   : > { %1452 = vmatprep.subr.mxu0 %v1410_v21  ;;  %1988 = vmatmul.mubr.msk.f32.vlgmr.msra.gmra.mxu1 %vm245_vm2, %v1899_v17  ;;  %v1738_v21 = vld [vmem:[%s2280_s2] sm:$0x7] }
  0xd5   : > { %1453 = vmatpush1.msra.mxu0 %v1409_v20  ;;  %1990 = vmatprep.subr.mxu1 %v2024_v0 }
  0xd6   : > { %v1577_v22 = vpop.permute.xlu0 %1576  ;;  %1900 = vmatmul.mubr.msk.f32.vlgmr.msra.gmra.mxu0 %vm245_vm2, %v1899_v17  ;;  %v1579_v23 = vpop.permute.xlu1 %1578  ;;  %1994 = vmatprep.mubr.msk.f32.mxu1 %vm2025_vm0, %v2024_v0  ;;  %v1742_v17 = vsub.s32 0, %v1741_v12 }
  0xd7   : > { %v1584_v24 = vsel %vm1580_vm9, %v1577_v22, %v1579_v23  ;;  %1991 = vmatpush3.msra.mxu1 %v1579_v23  ;;  %1658 = vmatprep.mubr.f32.mxu0 %v2024_v0 }
  0xd8   : > { %1622 = vmatprep.subr.mxu0 %v1584_v24  ;;  %1992 = vmatprep.subr.mxu1 %v2024_v0 }
  0xda   : > { %v1575_v25 = vpop.permute.xlu0 %1574  ;;  %v1571_v26 = vpop.permute.xlu1 %1570 }
  0xdb   : > { %v1583_v27 = vsel %vm1580_vm9, %v1575_v25, %v1577_v22  ;;  %v1746_v22 = vsub.s32 1, %v1741_v12 }
  0xdc   : > { %1623 = vmatpush1.msra.mxu0 %v1583_v27 }
  0xde   : > { %v1573_v29 = vpop.permute.xlu0 %1572  ;;  %v1569_v30 = vpop.permute.xlu1 %1568 }
  0xdf   : > { %v1581_v31 = vsel %vm1580_vm9, %v1569_v30, %v1571_v26  ;;  %1993 = vmatpush3.msra.mxu1 %v1573_v29  ;;  %v1582_v32 = vsel %vm1580_vm9, %v1571_v26, %v1573_v29  ;;  %v1751_v29 = vrot.slane %v1738_v21, %v1750_v18 }
  0xe0   : > { %1624 = vmatprep.subr.mxu0 %v1582_v32  ;;  %1995 = vmatmul.mubr.msk.f32.vlgmr.msra.gmra.mxu1 %vm245_vm2, %v1902_v28 }
  0xe1   : > { %1625 = vmatpush1.msra.mxu0 %v1581_v31 }
  0xe2   : > { %1903 = vmatmul.mubr.msk.f32.vlgmr.msra.gmra.mxu0 %vm245_vm2, %v1902_v28  ;;  %v1743_v28 = vrot.slane %v1738_v21, %v1742_v17 }
 0x14d   : > { %v386_v0 = vpop.f32.mrf.mxu1 }
 0x14f   : > { %v1940_v33 = vpop.f32.mrf.mxu1  ;;  %v315_v41 = vpop.f32.mrf.mxu0 }
 0x151   : > { %v317_v43 = vpop.f32.mrf.mxu0 }
 0x153   : > { %v530_v34 = vpop.f32.mrf.mxu1 }
 0x154   : > { %v531_v35 = vadd.f32 %v530_v34, %v386_v0  ;;  %v1747_v34 = vrot.slane %v1738_v21, %v1746_v22 }
 0x155   : > { %v1947_v36 = vpop.f32.mrf.mxu1  ;;  %v459_v44 = vpop.f32.mrf.mxu0 }
 0x156   : > { %v460_v57 = vadd.f32 %v459_v44, %v315_v41 }
 0x157   : > { %v461_v46 = vpop.f32.mrf.mxu0 }
 0x158   : > { %v462_v59 = vadd.f32 %v461_v46, %v317_v43 }
 0x159   : > { %v699_v37 = vpop.f32.mrf.mxu1 }
 0x15a   : > { %v705_v38 = vadd.f32 %v699_v37, %v531_v35  ;;  %v628_v48 = vpop.f32.mrf.mxu0 }
 0x15b   : > { %v1954_v39 = vpop.f32.mrf.mxu1  ;;  %v703_v61 = vadd.f32 %v628_v48, %v460_v57 }
 0x15c   : > { %v630_v49 = vpop.f32.mrf.mxu0 }
 0x15d   : > { %v704_v62 = vadd.f32 %v630_v49, %v462_v59 }
 0x165   : > { %v871_v40 = vpop.f32.mrf.mxu1 }
 0x166   : > { %v800_v51 = vpop.f32.mrf.mxu0  ;;  %v877_v2 = vadd.f32 %v871_v40, %v705_v38 }
 0x167   : > { %v1961_v42 = vpop.f32.mrf.mxu1  ;;  %v875_v1 = vadd.f32 %v800_v51, %v703_v61 }
 0x168   : > { %v802_v53 = vpop.f32.mrf.mxu0 }
 0x169   : > { %v876_v4 = vadd.f32 %v802_v53, %v704_v62 }
 0x171   : > { %v1043_v45 = vpop.f32.mrf.mxu1 }
 0x172   : > { %v972_v54 = vpop.f32.mrf.mxu0  ;;  %v1049_v9 = vadd.f32 %v1043_v45, %v877_v2 }
 0x173   : > { %v1968_v47 = vpop.f32.mrf.mxu1  ;;  %v1047_v8 = vadd.f32 %v972_v54, %v875_v1 }
 0x174   : > { %v974_v56 = vpop.f32.mrf.mxu0 }
 0x175   : > { %v1048_v10 = vadd.f32 %v974_v56, %v876_v4 }
 0x17d   : > { %v1215_v50 = vpop.f32.mrf.mxu1 }
 0x17e   : > { %v1144_v60 = vpop.f32.mrf.mxu0  ;;  %v1221_v14 = vadd.f32 %v1215_v50, %v1049_v9 }
 0x17f   : > { %v1975_v52 = vpop.f32.mrf.mxu1  ;;  %v1219_v13 = vadd.f32 %v1144_v60, %v1047_v8 }
 0x180   : > { %v1146_v63 = vpop.f32.mrf.mxu0 }
 0x181   : > { %v1220_v16 = vadd.f32 %v1146_v63, %v1048_v10 }
 0x189   : > { %v1387_v55 = vpop.f32.mrf.mxu1 }
 0x18a   : > { %v1316_v5 = vpop.f32.mrf.mxu0  ;;  %v1393_v20 = vadd.f32 %v1387_v55, %v1221_v14 }
 0x18b   : > { %v1982_v58 = vpop.f32.mrf.mxu1  ;;  %v1391_v19 = vadd.f32 %v1316_v5, %v1219_v13 }
 0x18c   : > { %v1318_v11 = vpop.f32.mrf.mxu0 }
 0x18d   : > { %v1392_v25 = vadd.f32 %v1318_v11, %v1220_v16 }
 0x194   : > { %v1559_v3 = vpop.f32.mrf.mxu1 }
 0x195   : > { %v1565_v26 = vadd.f32 %v1559_v3, %v1393_v20 }
 0x196   : > { %v1989_v6 = vpop.f32.mrf.mxu1  ;;  %v1488_v15 = vpop.f32.mrf.mxu0 }
 0x197   : > { %v1563_v27 = vadd.f32 %v1488_v15, %v1391_v19 }
 0x198   : > { %v1490_v23 = vpop.f32.mrf.mxu0 }
 0x199   : > { %v1564_v32 = vadd.f32 %v1490_v23, %v1392_v25 }
 0x1a0   : > { %v1731_v24 = vpop.f32.mrf.mxu1 }
 0x1a1   : > { %v1737_v0 = vadd.f32 %v1731_v24, %v1565_v26 }
 0x1a2   : > { %v1660_v30 = vpop.f32.mrf.mxu0  ;;  %v1996_v31 = vpop.f32.mrf.mxu1 }
 0x1a3   : > { %v1735_v33 = vadd.f32 %v1660_v30, %v1563_v27  ;;  %v1757_v38 = vmul.f32 %v1751_v29, %v1737_v0 }
 0x1a4   : > { %v1662_v35 = vpop.f32.mrf.mxu0 }
 0x1a5   : > { %v1755_v36 = vmul.f32 %v1743_v28, %v1735_v33  ;;  %v1736_v37 = vadd.f32 %v1662_v35, %v1564_v32  ;;  %v1763_v43 = vsel %vm1762_vm11, %v1757_v38, 0.0 }
 0x1a7   : > { %v1756_v39 = vmul.f32 %v1747_v34, %v1736_v37  ;;  %v1759_v40 = vsel %vm1758_vm10, %v1755_v36, 0.0 }
 0x1a9   : > { %v1760_v41 = vsel %vm1758_vm10, %v1756_v39, 0.0 }
 0x1aa   : > { %v1761_v42 = vadd.f32 %v1760_v41, %v1759_v40 }
 0x1ac   : > { %v1764_v44 = vadd.f32 %v1763_v43, %v1761_v42 }
 0x1ae   : > { %1765 = vadd.xlane.f32.xlu0 %v1764_v44 }
 0x237   : > { %v1766_v45 = vpop.xlane.xlu0 %1765 }
 0x238   : > { %v1767_v46 = vmul.f32 0.00390625, %v1766_v45 }
 0x23a   : > { %v1768_v47 = vsub.f32 %v1735_v33, %v1767_v46  ;;  %v1769_v48 = vsub.f32 %v1736_v37, %v1767_v46  ;;  %v1770_v49 = vsub.f32 %v1737_v0, %v1767_v46  ;;  %1775 = vst.msk [vmem:[%s202_s28] sm:$0xf] %vm1774_vm12, %v1767_v46 }
 0x23c   : > { %v1771_v50 = vmul.f32 %v1768_v47, %v1743_v28  ;;  %v1772_v51 = vmul.f32 %v1769_v48, %v1747_v34  ;;  %v1773_v52 = vmul.f32 %v1770_v49, %v1751_v29 }
 0x23e   : > { %v1776_v53 = vmul.f32 %v1771_v50, %v1771_v50  ;;  %v1777_v54 = vmul.f32 %v1772_v51, %v1772_v51  ;;  %v1778_v55 = vmul.f32 %v1773_v52, %v1773_v52 }
 0x240   : > { %v1779_v56 = vsel %vm1758_vm10, %v1776_v53, 0.0  ;;  %v1780_v57 = vsel %vm1758_vm10, %v1777_v54, 0.0  ;;  %v1782_v59 = vsel %vm1762_vm11, %v1778_v55, 0.0 }
 0x241   : > { %v1781_v58 = vadd.f32 %v1780_v57, %v1779_v56 }
 0x243   : > { %v1783_v60 = vadd.f32 %v1782_v59, %v1781_v58 }
 0x245   : > { %1784 = vadd.xlane.f32.xlu1 %v1783_v60 }
 0x2ce   : > { %v1785_v61 = vpop.xlane.xlu1 %1784 }
 0x2cf   : > { %1786 = vst.msk [vmem:[%s206_s30] sm:$0xf] %vm1774_vm12, %v1785_v61 }
 0x2d0 PF: > { %s15_s15 = sadd.s32 1, %s2022_s15  }
 0x2d1   : > { %p12_p4 = scmp.ge.s32.totalorder %s15_s15, 4  }
 0x2d3   :  { %14 = sbr.rel (!%p12_p4) target bundleno = 1 (0x1), region = 82 }

// kernel: attention_block_forward.3
= control target key start
LH: loop header
LB: loop body
LE: loop exit
PB: predicated region body
PF: predicated region fallthrough
CT: control target
= control target key end

     0   :  { %s2539_s26 = smov 0   ;;  %s2940_s0 = inlined_call_operand.vmem [shape: f32[2,16,384], index: 0, kind: input, shape index: {}]   ;;  %s2941_s1 = inlined_call_operand.vmem [shape: f32[9,4,16], index: 1, kind: input, shape index: {}]   ;;  %s2942_s2 = inlined_call_operand.vmem [shape: f32[9,4,1], index: 2, kind: input, shape index: {}]   ;;  %s2943_s3 = inlined_call_operand.vmem [shape: f32[4,1], index: 3, kind: input, shape index: {}]   ;;  %s2944_s4 = inlined_call_operand.vmem [shape: f32[4,1], index: 4, kind: input, shape index: {}]   ;;  %s2945_s5 = inlined_call_operand.<no memory space> [shape: f32[1,1], index: 5, kind: input, shape index: {}]   ;;  %s2946_s6 = inlined_call_operand.vmem [shape: f32[1,288], index: 6, kind: input, shape index: {}]   ;;  %s2947_s7 = inlined_call_operand.vmem [shape: f32[2,16,288], index: 7, kind: output, shape index: {}]  }
   0x1   :  { %12 = sst [smem:[#allocation3]] %s2945_s5 }
   0x2 LB: > { %s2289_s27 = sadd.s32 4294967295, %s2482_s26   ;;  %p2293_p0 = scmp.ge.s32.totalorder %s2482_s26, 1  ;;  %s2482_s26 = sphi %s2539_s26, %s18_s26  }
   0x3   : > { %p238_p1 = scmp.lt.s32.totalorder %s2482_s26, 3 }
   0x5   : > { %p239_p2 = pnand %p2293_p0, %p238_p1 }
   0x6   : > { %p270_p3 = scmp.lt.s32.totalorder (!%p239_p2), %s2289_s27, 1  ;;  %s2486_s8 = smov (!%p239_p2), 127  }
   0x7   : > { %242 = sbr.rel (%p239_p2) target bundleno = 789 (0x315), region = 48  ;;  %s2487_s9 = smov (!%p239_p2), 126  }
   0x8   : > { %s2488_s10 = smov (!%p239_p2), 110   ;;  %s2489_s11 = smov (!%p239_p2), 109  }
   0x9   : > { %s2490_s12 = smov (!%p239_p2), 108   ;;  %s2491_s13 = smov (!%p239_p2), 92  }
   0xa   : > { %s2492_s14 = smov (!%p239_p2), 91   ;;  %s2494_s15 = smov (!%p239_p2), 90  }
   0xb   : > { %s2495_s29 = smov (!%p239_p2), 19  }
   0xc   : > { %v2484_v0 = vmov 0.0   ;;  %s2949_s27 = smov (!%p270_p3, %s2289_s27), 1  ;;  %vm2485_vm0 = vmmov 0   ;;  %v2493_v7 = vmov 0   ;;  %v1811_v8 = vld [vmem:[%s2943_s3] sm:$0xf] }
   0xd   : > { %2365 = vmatprep.subr.mxu1 %v2484_v0  ;;  %1852 = vst [vmem:[#allocation2] sm:$0xff] %v2484_v0  ;;  %1853 = vst [vmem:[#allocation2 + $0x8] sm:$0xf] %v2484_v0  ;;  %386 = vmatprep.mubr.f32.mxu0 %v2484_v0  ;;  %s2428_s5 = smul.u32 48, %s2949_s27  ;;  %v1820_v9 = vld [vmem:[%s2944_s4] sm:$0xf] }
   0xe   : > { %2369 = vmatprep.mubr.msk.f32.mxu1 %vm2485_vm0, %v2484_v0  ;;  %2449 = vset.pattern.permute.xlu0 %v2493_v7  ;;  %vm307_vm1 = vcmask 1039360   ;;  %v2296_v18 = vld [vmem:[%s2941_s1 + $0x4] sm:$0xf]  ;;  %vm318_vm2 = vcmask 130048   ;;  %vm621_vm3 = vcmask 1031168   ;;  %vm793_vm4 = vcmask 900096  }
   0xf   : > { %s274_s30 = scalar_lea.vmem %s2940_s0, %s2428_s5  ;;  %2450 = vset.pattern.permute.xlu1 %v2493_v7  ;;  %v280_v23 = vld [vmem:[%s2941_s1] sm:$0xf]  ;;  %v2301_v30 = vld [vmem:[%s2941_s1 + $0x8] sm:$0xf]  ;;  %v2304_v41 = vld [vmem:[%s2941_s1 + $0xc] sm:$0xf] }
  0x10   : > { %v2561_v1 = vld [vmem:[%s274_s30 + $0x20] sm:$0xff]  ;;  %v2563_v2 = vld [vmem:[%s274_s30 + $0x18] sm:$0xff]  ;;  %v2569_v3 = vld [vmem:[%s274_s30 + $0x28] sm:$0xff]  ;;  %vm965_vm5 = vcmask 891904   ;;  %vm1137_vm6 = vcmask 883712   ;;  %vm1309_vm7 = vcmask 752640  }
  0x11   : > { %303 = vrot.lane.b32.xlu0 %v2561_v1, %s2486_s8  ;;  %301 = vrot.lane.b32.xlu1 %v2563_v2, %s2486_s8  ;;  %v2571_v4 = vld [vmem:[%s274_s30 + $0x8] sm:$0xff]  ;;  %v2577_v5 = vld [vmem:[%s274_s30 + $0x10] sm:$0xff]  ;;  %vm1481_vm8 = vcmask 744448   ;;  %vm1653_vm9 = vcmask 736256   ;;  %vm1868_vm10 = vcmask 1043608   ;;  %vm1869_vm11 = vcmask 1047556  }
  0x12   : > { %v2579_v6 = vld [vmem:[%s274_s30] sm:$0xff]  ;;  %v2307_v52 = vld [vmem:[%s2941_s1 + $0x10] sm:$0xf]  ;;  %v2310_v63 = vld [vmem:[%s2941_s1 + $0x14] sm:$0xf]  ;;  %vm1863_vm12 = vcmask 154624  }
  0x13   : > { %vm1870_vm13 = vmor %vm1869_vm11, %vm1868_vm10  ;;  %vm1872_vm14 = vcmask 412672   ;;  %vm2138_vm15 = vcmask 257024  }
  0x15   : > { %305 = vrot.lane.b32.xlu0 %v2569_v3, %s2486_s8  ;;  %297 = vrot.lane.b32.xlu1 %v2571_v4, %s2486_s8 }
  0x19   : > { %299 = vrot.lane.b32.xlu0 %v2577_v5, %s2486_s8  ;;  %295 = vrot.lane.b32.xlu1 %v2579_v6, %s2486_s8 }
  0x1d   : > { %617 = vrot.lane.b32.xlu0 %v2561_v1, %s2487_s9  ;;  %619 = vrot.lane.b32.xlu1 %v2569_v3, %s2487_s9 }
  0x21   : > { %615 = vrot.lane.b32.xlu0 %v2563_v2, %s2487_s9  ;;  %611 = vrot.lane.b32.xlu1 %v2571_v4, %s2487_s9 }
  0x25   : > { %613 = vrot.lane.b32.xlu0 %v2577_v5, %s2487_s9  ;;  %609 = vrot.lane.b32.xlu1 %v2579_v6, %s2487_s9 }
  0x29   : > { %789 = vrot.lane.b32.xlu0 %v2561_v1, %s2488_s10  ;;  %791 = vrot.lane.b32.xlu1 %v2569_v3, %s2488_s10 }
  0x2d   : > { %787 = vrot.lane.b32.xlu0 %v2563_v2, %s2488_s10  ;;  %783 = vrot.lane.b32.xlu1 %v2571_v4, %s2488_s10 }
  0x31   : > { %785 = vrot.lane.b32.xlu0 %v2577_v5, %s2488_s10  ;;  %781 = vrot.lane.b32.xlu1 %v2579_v6, %s2488_s10 }
  0x35   : > { %961 = vrot.lane.b32.xlu0 %v2561_v1, %s2489_s11  ;;  %963 = vrot.lane.b32.xlu1 %v2569_v3, %s2489_s11 }
  0x39   : > { %959 = vrot.lane.b32.xlu0 %v2563_v2, %s2489_s11  ;;  %955 = vrot.lane.b32.xlu1 %v2571_v4, %s2489_s11 }
  0x3d   : > { %957 = vrot.lane.b32.xlu0 %v2577_v5, %s2489_s11  ;;  %953 = vrot.lane.b32.xlu1 %v2579_v6, %s2489_s11 }
  0x41   : > { %1133 = vrot.lane.b32.xlu0 %v2561_v1, %s2490_s12  ;;  %1135 = vrot.lane.b32.xlu1 %v2569_v3, %s2490_s12 }
  0x45   : > { %1131 = vrot.lane.b32.xlu0 %v2563_v2, %s2490_s12  ;;  %1127 = vrot.lane.b32.xlu1 %v2571_v4, %s2490_s12 }
  0x49   : > { %1129 = vrot.lane.b32.xlu0 %v2577_v5, %s2490_s12  ;;  %1125 = vrot.lane.b32.xlu1 %v2579_v6, %s2490_s12 }
  0x4d   : > { %1305 = vrot.lane.b32.xlu0 %v2561_v1, %s2491_s13  ;;  %1307 = vrot.lane.b32.xlu1 %v2569_v3, %s2491_s13 }
  0x51   : > { %1303 = vrot.lane.b32.xlu0 %v2563_v2, %s2491_s13  ;;  %1299 = vrot.lane.b32.xlu1 %v2571_v4, %s2491_s13 }
  0x55   : > { %1301 = vrot.lane.b32.xlu0 %v2577_v5, %s2491_s13  ;;  %1297 = vrot.lane.b32.xlu1 %v2579_v6, %s2491_s13 }
  0x59   : > { %1477 = vrot.lane.b32.xlu0 %v2561_v1, %s2492_s14  ;;  %1479 = vrot.lane.b32.xlu1 %v2569_v3, %s2492_s14 }
  0x5d   : > { %1475 = vrot.lane.b32.xlu0 %v2563_v2, %s2492_s14  ;;  %1471 = vrot.lane.b32.xlu1 %v2571_v4, %s2492_s14 }
  0x61   : > { %1473 = vrot.lane.b32.xlu0 %v2577_v5, %s2492_s14  ;;  %1469 = vrot.lane.b32.xlu1 %v2579_v6, %s2492_s14 }
  0x65   : > { %1649 = vrot.lane.b32.xlu0 %v2561_v1, %s2494_s15  ;;  %1651 = vrot.lane.b32.xlu1 %v2569_v3, %s2494_s15 }
  0x69   : > { %1647 = vrot.lane.b32.xlu0 %v2563_v2, %s2494_s15  ;;  %1643 = vrot.lane.b32.xlu1 %v2571_v4, %s2494_s15 }
  0x6d   : > { %1645 = vrot.lane.b32.xlu0 %v2577_v5, %s2494_s15  ;;  %1641 = vrot.lane.b32.xlu1 %v2579_v6, %s2494_s15 }
  0x71   : > { %1814 = vperm.xlu0 %2449, %v1811_v8   ;;  %1823 = vperm.xlu1 %2450, %v1820_v9  }
  0x83   : > { %v304_v10 = vpop.permute.xlu0 %303  ;;  %v302_v11 = vpop.permute.xlu1 %301 }
  0x84   : > { %v310_v15 = vsel %vm307_vm1, %v302_v11, %v304_v10 }
  0x87   : > { %v306_v12 = vpop.permute.xlu0 %305  ;;  %v298_v13 = vpop.permute.xlu1 %297 }
  0x88   : > { %2366 = vmatpush3.msra.mxu1 %v306_v12  ;;  %v311_v14 = vsel %vm307_vm1, %v304_v10, %v306_v12 }
  0x89   : > { %350 = vmatprep.subr.mxu0 %v311_v14  ;;  %2367 = vmatprep.subr.mxu1 %v2484_v0 }
  0x8a   : > { %351 = vmatpush1.msra.mxu0 %v310_v15 }
  0x8b   : > { %v300_v16 = vpop.permute.xlu0 %299  ;;  %v296_v17 = vpop.permute.xlu1 %295 }
  0x8c   : > { %2368 = vmatpush3.msra.mxu1 %v300_v16  ;;  %v309_v19 = vsel %vm307_vm1, %v298_v13, %v300_v16  ;;  %v308_v20 = vsel %vm307_vm1, %v296_v17, %v298_v13 }
  0x8d   : > { %352 = vmatprep.subr.mxu0 %v309_v19  ;;  %2372 = vmatprep.subr.mxu1 %v2484_v0  ;;  %v2313_v19 = vld [vmem:[%s2941_s1 + $0x18] sm:$0xf] }
  0x8e   : > { %353 = vmatpush1.msra.mxu0 %v308_v20  ;;  %2370 = vmatmul.mubr.msk.f32.vlgmr.msra.gmra.mxu1 %vm318_vm2, %v2296_v18 }
  0x8f   : > { %2373 = vmatpush3.msra.mxu1 %v2569_v3  ;;  %v618_v21 = vpop.permute.xlu0 %617  ;;  %494 = vmatprep.subr.mxu0 %v2561_v1  ;;  %v620_v22 = vpop.permute.xlu1 %619 }
  0x90   : > { %2374 = vmatprep.subr.mxu1 %v2484_v0  ;;  %2297 = vmatmul.mubr.msk.f32.vlgmr.msra.gmra.mxu0 %vm318_vm2, %v2296_v18  ;;  %v625_v25 = vsel %vm621_vm3, %v618_v21, %v620_v22 }
  0x91   : > { %495 = vmatpush1.msra.mxu0 %v2563_v2  ;;  %2375 = vmatpush3.msra.mxu1 %v2577_v5 }
  0x92   : > { %496 = vmatprep.subr.mxu0 %v2571_v4  ;;  %2376 = vmatprep.mubr.msk.f32.mxu1 %vm2485_vm0, %v2484_v0 }
  0x93   : > { %2379 = vmatprep.subr.mxu1 %v2484_v0  ;;  %497 = vmatpush1.msra.mxu0 %v2579_v6  ;;  %v616_v24 = vpop.permute.xlu0 %615  ;;  %v612_v26 = vpop.permute.xlu1 %611 }
  0x94   : > { %2377 = vmatmul.mubr.msk.f32.vlgmr.msra.gmra.mxu1 %vm318_vm2, %v280_v23  ;;  %v624_v27 = vsel %vm621_vm3, %v616_v24, %v618_v21  ;;  %663 = vmatprep.subr.mxu0 %v625_v25 }
  0x95   : > { %2380 = vmatpush3.msra.mxu1 %v620_v22  ;;  %530 = vmatprep.mubr.f32.mxu0 %v2484_v0 }
  0x96   : > { %2299 = vmatmul.mubr.msk.f32.vlgmr.msra.gmra.mxu0 %vm318_vm2, %v280_v23  ;;  %2381 = vmatprep.subr.mxu1 %v2484_v0 }
  0x97   : > { %664 = vmatpush1.msra.mxu0 %v624_v27  ;;  %v614_v28 = vpop.permute.xlu0 %613  ;;  %v610_v29 = vpop.permute.xlu1 %609  ;;  %2383 = vmatprep.mubr.msk.f32.mxu1 %vm2485_vm0, %v2484_v0 }
  0x98   : > { %v622_v31 = vsel %vm621_vm3, %v610_v29, %v612_v26  ;;  %2382 = vmatpush3.msra.mxu1 %v614_v28  ;;  %v623_v32 = vsel %vm621_vm3, %v612_v26, %v614_v28  ;;  %699 = vmatprep.mubr.f32.mxu0 %v2484_v0 }
  0x99   : > { %665 = vmatprep.subr.mxu0 %v623_v32  ;;  %2386 = vmatprep.subr.mxu1 %v2484_v0 }
  0x9a   : > { %666 = vmatpush1.msra.mxu0 %v622_v31  ;;  %2384 = vmatmul.mubr.msk.f32.vlgmr.msra.gmra.mxu1 %vm318_vm2, %v2301_v30 }
  0x9b   : > { %v790_v33 = vpop.permute.xlu0 %789  ;;  %v792_v34 = vpop.permute.xlu1 %791  ;;  %2302 = vmatmul.mubr.msk.f32.vlgmr.msra.gmra.mxu0 %vm318_vm2, %v2301_v30  ;;  %2390 = vmatprep.mubr.msk.f32.mxu1 %vm2485_vm0, %v2484_v0  ;;  %v2316_v30 = vld [vmem:[%s2941_s1 + $0x1c] sm:$0xf] }
  0x9c   : > { %v797_v35 = vsel %vm793_vm4, %v790_v33, %v792_v34  ;;  %2387 = vmatpush3.msra.mxu1 %v792_v34  ;;  %871 = vmatprep.mubr.f32.mxu0 %v2484_v0 }
  0x9d   : > { %835 = vmatprep.subr.mxu0 %v797_v35  ;;  %2388 = vmatprep.subr.mxu1 %v2484_v0 }
  0x9f   : > { %v788_v36 = vpop.permute.xlu0 %787  ;;  %v784_v37 = vpop.permute.xlu1 %783 }
  0xa0   : > { %v796_v38 = vsel %vm793_vm4, %v788_v36, %v790_v33 }
  0xa1   : > { %836 = vmatpush1.msra.mxu0 %v796_v38 }
  0xa3   : > { %v786_v39 = vpop.permute.xlu0 %785  ;;  %v782_v40 = vpop.permute.xlu1 %781 }
  0xa4   : > { %v794_v42 = vsel %vm793_vm4, %v782_v40, %v784_v37  ;;  %2389 = vmatpush3.msra.mxu1 %v786_v39  ;;  %v795_v43 = vsel %vm793_vm4, %v784_v37, %v786_v39  ;;  %v2319_v37 = vld [vmem:[%s2941_s1 + $0x20] sm:$0xf] }
  0xa5   : > { %837 = vmatprep.subr.mxu0 %v795_v43  ;;  %2393 = vmatprep.subr.mxu1 %v2484_v0 }
  0xa6   : > { %838 = vmatpush1.msra.mxu0 %v794_v42  ;;  %2391 = vmatmul.mubr.msk.f32.vlgmr.msra.gmra.mxu1 %vm318_vm2, %v2304_v41 }
  0xa7   : > { %v962_v44 = vpop.permute.xlu0 %961  ;;  %v964_v45 = vpop.permute.xlu1 %963  ;;  %2305 = vmatmul.mubr.msk.f32.vlgmr.msra.gmra.mxu0 %vm318_vm2, %v2304_v41  ;;  %2397 = vmatprep.mubr.msk.f32.mxu1 %vm2485_vm0, %v2484_v0 }
  0xa8   : > { %v969_v46 = vsel %vm965_vm5, %v962_v44, %v964_v45  ;;  %2394 = vmatpush3.msra.mxu1 %v964_v45  ;;  %1043 = vmatprep.mubr.f32.mxu0 %v2484_v0 }
  0xa9   : > { %1007 = vmatprep.subr.mxu0 %v969_v46  ;;  %2395 = vmatprep.subr.mxu1 %v2484_v0 }
  0xab   : > { %v960_v47 = vpop.permute.xlu0 %959  ;;  %v956_v48 = vpop.permute.xlu1 %955 }
  0xac   : > { %v968_v49 = vsel %vm965_vm5, %v960_v47, %v962_v44 }
  0xad   : > { %1008 = vmatpush1.msra.mxu0 %v968_v49 }
  0xaf   : > { %v958_v50 = vpop.permute.xlu0 %957  ;;  %v954_v51 = vpop.permute.xlu1 %953 }
  0xb0   : > { %v966_v53 = vsel %vm965_vm5, %v954_v51, %v956_v48  ;;  %2396 = vmatpush3.msra.mxu1 %v958_v50  ;;  %v967_v54 = vsel %vm965_vm5, %v956_v48, %v958_v50 }
  0xb1   : > { %1009 = vmatprep.subr.mxu0 %v967_v54  ;;  %2400 = vmatprep.subr.mxu1 %v2484_v0 }
  0xb2   : > { %1010 = vmatpush1.msra.mxu0 %v966_v53  ;;  %2398 = vmatmul.mubr.msk.f32.vlgmr.msra.gmra.mxu1 %vm318_vm2, %v2307_v52 }
  0xb3   : > { %v1134_v55 = vpop.permute.xlu0 %1133  ;;  %v1136_v56 = vpop.permute.xlu1 %1135  ;;  %2308 = vmatmul.mubr.msk.f32.vlgmr.msra.gmra.mxu0 %vm318_vm2, %v2307_v52  ;;  %2404 = vmatprep.mubr.msk.f32.mxu1 %vm2485_vm0, %v2484_v0 }
  0xb4   : > { %v1141_v57 = vsel %vm1137_vm6, %v1134_v55, %v1136_v56  ;;  %2401 = vmatpush3.msra.mxu1 %v1136_v56  ;;  %1215 = vmatprep.mubr.f32.mxu0 %v2484_v0 }
  0xb5   : > { %1179 = vmatprep.subr.mxu0 %v1141_v57  ;;  %2402 = vmatprep.subr.mxu1 %v2484_v0 }
  0xb7   : > { %v1132_v58 = vpop.permute.xlu0 %1131  ;;  %v1128_v59 = vpop.permute.xlu1 %1127 }
  0xb8   : > { %v1140_v60 = vsel %vm1137_vm6, %v1132_v58, %v1134_v55 }
  0xb9   : > { %1180 = vmatpush1.msra.mxu0 %v1140_v60 }
  0xbb   : > { %v1130_v61 = vpop.permute.xlu0 %1129  ;;  %v1126_v62 = vpop.permute.xlu1 %1125 }
  0xbc   : > { %v1138_v7 = vsel %vm1137_vm6, %v1126_v62, %v1128_v59  ;;  %2403 = vmatpush3.msra.mxu1 %v1130_v61  ;;  %v1139_v8 = vsel %vm1137_vm6, %v1128_v59, %v1130_v61 }
  0xbd   : > { %1181 = vmatprep.subr.mxu0 %v1139_v8  ;;  %2407 = vmatprep.subr.mxu1 %v2484_v0 }
  0xbe   : > { %1182 = vmatpush1.msra.mxu0 %v1138_v7  ;;  %2405 = vmatmul.mubr.msk.f32.vlgmr.msra.gmra.mxu1 %vm318_vm2, %v2310_v63 }
  0xbf   : > { %v1306_v9 = vpop.permute.xlu0 %1305  ;;  %v1308_v10 = vpop.permute.xlu1 %1307  ;;  %2311 = vmatmul.mubr.msk.f32.vlgmr.msra.gmra.mxu0 %vm318_vm2, %v2310_v63  ;;  %2411 = vmatprep.mubr.msk.f32.mxu1 %vm2485_vm0, %v2484_v0 }
  0xc0   : > { %v1313_v11 = vsel %vm1309_vm7, %v1306_v9, %v1308_v10  ;;  %2408 = vmatpush3.msra.mxu1 %v1308_v10  ;;  %1387 = vmatprep.mubr.f32.mxu0 %v2484_v0 }
  0xc1   : > { %1351 = vmatprep.subr.mxu0 %v1313_v11  ;;  %2409 = vmatprep.subr.mxu1 %v2484_v0 }
  0xc3   : > { %v1304_v12 = vpop.permute.xlu0 %1303  ;;  %v1300_v13 = vpop.permute.xlu1 %1299 }
  0xc4   : > { %v1312_v14 = vsel %vm1309_vm7, %v1304_v12, %v1306_v9 }
  0xc5   : > { %1352 = vmatpush1.msra.mxu0 %v1312_v14 }
  0xc7   : > { %v1302_v15 = vpop.permute.xlu0 %1301  ;;  %v1298_v16 = vpop.permute.xlu1 %1297 }
  0xc8   : > { %v1310_v17 = vsel %vm1309_vm7, %v1298_v16, %v1300_v13  ;;  %2410 = vmatpush3.msra.mxu1 %v1302_v15  ;;  %v1311_v18 = vsel %vm1309_vm7, %v1300_v13, %v1302_v15 }
  0xc9   : > { %1353 = vmatprep.subr.mxu0 %v1311_v18  ;;  %2414 = vmatprep.subr.mxu1 %v2484_v0 }
  0xca   : > { %1354 = vmatpush1.msra.mxu0 %v1310_v17  ;;  %2412 = vmatmul.mubr.msk.f32.vlgmr.msra.gmra.mxu1 %vm318_vm2, %v2313_v19 }
  0xcb   : > { %v1478_v20 = vpop.permute.xlu0 %1477  ;;  %v1480_v21 = vpop.permute.xlu1 %1479  ;;  %2314 = vmatmul.mubr.msk.f32.vlgmr.msra.gmra.mxu0 %vm318_vm2, %v2313_v19  ;;  %2418 = vmatprep.mubr.msk.f32.mxu1 %vm2485_vm0, %v2484_v0 }
  0xcc   : > { %v1485_v22 = vsel %vm1481_vm8, %v1478_v20, %v1480_v21  ;;  %2415 = vmatpush3.msra.mxu1 %v1480_v21  ;;  %1559 = vmatprep.mubr.f32.mxu0 %v2484_v0 }
  0xcd   : > { %1523 = vmatprep.subr.mxu0 %v1485_v22  ;;  %2416 = vmatprep.subr.mxu1 %v2484_v0 }
  0xcf   : > { %v1476_v23 = vpop.permute.xlu0 %1475  ;;  %v1472_v24 = vpop.permute.xlu1 %1471 }
  0xd0   : > { %v1484_v25 = vsel %vm1481_vm8, %v1476_v23, %v1478_v20 }
  0xd1   : > { %1524 = vmatpush1.msra.mxu0 %v1484_v25  ;;  %v1834_v25 = vlaneseq }
  0xd3   : > { %v1474_v26 = vpop.permute.xlu0 %1473  ;;  %v1470_v27 = vpop.permute.xlu1 %1469 }
  0xd4   : > { %v1482_v28 = vsel %vm1481_vm8, %v1470_v27, %v1472_v24  ;;  %2417 = vmatpush3.msra.mxu1 %v1474_v26  ;;  %v1483_v29 = vsel %vm1481_vm8, %v1472_v24, %v1474_v26 }
  0xd5   : > { %1525 = vmatprep.subr.mxu0 %v1483_v29  ;;  %2421 = vmatprep.subr.mxu1 %v2484_v0 }
  0xd6   : > { %1526 = vmatpush1.msra.mxu0 %v1482_v28  ;;  %2419 = vmatmul.mubr.msk.f32.vlgmr.msra.gmra.mxu1 %vm318_vm2, %v2316_v30 }
  0xd7   : > { %v1650_v31 = vpop.permute.xlu0 %1649  ;;  %2317 = vmatmul.mubr.msk.f32.vlgmr.msra.gmra.mxu0 %vm318_vm2, %v2316_v30  ;;  %v1652_v32 = vpop.permute.xlu1 %1651  ;;  %2425 = vmatprep.mubr.msk.f32.mxu1 %vm2485_vm0, %v2484_v0  ;;  %vm2123_vm0 = vcmask 1043456  }
  0xd8   : > { %v1657_v33 = vsel %vm1653_vm9, %v1650_v31, %v1652_v32  ;;  %2422 = vmatpush3.msra.mxu1 %v1652_v32  ;;  %1731 = vmatprep.mubr.f32.mxu0 %v2484_v0 }
  0xd9   : > { %1695 = vmatprep.subr.mxu0 %v1657_v33  ;;  %2423 = vmatprep.subr.mxu1 %v2484_v0 }
  0xdb   : > { %v1648_v34 = vpop.permute.xlu0 %1647  ;;  %v1644_v35 = vpop.permute.xlu1 %1643 }
  0xdc   : > { %v1656_v36 = vsel %vm1653_vm9, %v1648_v34, %v1650_v31  ;;  %v1835_v31 = vshrl.u32 %v1834_v25, 7 }
  0xdd   : > { %1696 = vmatpush1.msra.mxu0 %v1656_v36 }
  0xdf   : > { %v1646_v38 = vpop.permute.xlu0 %1645  ;;  %v1642_v39 = vpop.permute.xlu1 %1641 }
  0xe0   : > { %v1654_v40 = vsel %vm1653_vm9, %v1642_v39, %v1644_v35  ;;  %2424 = vmatpush3.msra.mxu1 %v1646_v38  ;;  %v1655_v41 = vsel %vm1653_vm9, %v1644_v35, %v1646_v38  ;;  %v1844_v38 = vsub.s32 2, %v1835_v31 }
  0xe1   : > { %1697 = vmatprep.subr.mxu0 %v1655_v41  ;;  %2426 = vmatmul.mubr.msk.f32.vlgmr.msra.gmra.mxu1 %vm318_vm2, %v2319_v37 }
  0xe2   : > { %1698 = vmatpush1.msra.mxu0 %v1654_v40 }
  0xe3   : > { %2320 = vmatmul.mubr.msk.f32.vlgmr.msra.gmra.mxu0 %vm318_vm2, %v2319_v37 }
  0xec   : > { %v1815_v35 = vpop.permute.xlu0 %1814 }
 0x14e   : > { %v459_v0 = vpop.f32.mrf.mxu1 }
 0x150   : > { %v2371_v42 = vpop.f32.mrf.mxu1  ;;  %v388_v48 = vpop.f32.mrf.mxu0 }
 0x151   : > { %v1832_v42 = vld [vmem:[%s2946_s6] sm:$0x7] }
 0x152   : > { %v390_v50 = vpop.f32.mrf.mxu0 }
 0x154   : > { %v603_v43 = vpop.f32.mrf.mxu1 }
 0x155   : > { %v604_v62 = vadd.f32 %v603_v43, %v459_v0  ;;  %v1824_v0 = vpop.permute.xlu1 %1823 }
 0x156   : > { %v2378_v44 = vpop.f32.mrf.mxu1  ;;  %v532_v51 = vpop.f32.mrf.mxu0 }
 0x157   : > { %v533_v8 = vadd.f32 %v532_v51, %v388_v48 }
 0x158   : > { %v534_v53 = vpop.f32.mrf.mxu0 }
 0x159   : > { %v535_v11 = vadd.f32 %v534_v53, %v390_v50  ;;  %v1836_v50 = vsub.s32 0, %v1835_v31 }
 0x15a   : > { %v772_v45 = vpop.f32.mrf.mxu1 }
 0x15b   : > { %v701_v55 = vpop.f32.mrf.mxu0  ;;  %v778_v9 = vadd.f32 %v772_v45, %v604_v62 }
 0x15c   : > { %v2385_v46 = vpop.f32.mrf.mxu1  ;;  %v776_v13 = vadd.f32 %v701_v55, %v533_v8 }
 0x15d   : > { %v703_v56 = vpop.f32.mrf.mxu0 }
 0x15e   : > { %v777_v15 = vadd.f32 %v703_v56, %v535_v11  ;;  %v1874_v11 = vld [vmem:[%s2942_s2] sm:$0xf] }
 0x166   : > { %v944_v47 = vpop.f32.mrf.mxu1 }
 0x167   : > { %v873_v58 = vpop.f32.mrf.mxu0  ;;  %v950_v14 = vadd.f32 %v944_v47, %v778_v9 }
 0x168   : > { %v2392_v49 = vpop.f32.mrf.mxu1  ;;  %v948_v17 = vadd.f32 %v873_v58, %v776_v13  ;;  %v1837_v58 = vrot.slane %v1832_v42, %v1836_v50  ;;  %v2324_v13 = vld [vmem:[%s2942_s2 + $0xc] sm:$0xf] }
 0x169   : > { %v875_v60 = vpop.f32.mrf.mxu0  ;;  %v1845_v49 = vrot.slane %v1832_v42, %v1844_v38 }
 0x16a   : > { %v949_v19 = vadd.f32 %v875_v60, %v777_v15  ;;  %v2326_v15 = vld [vmem:[%s2942_s2 + $0x14] sm:$0xf] }
 0x172   : > { %v1116_v52 = vpop.f32.mrf.mxu1 }
 0x173   : > { %v1045_v61 = vpop.f32.mrf.mxu0  ;;  %v1122_v18 = vadd.f32 %v1116_v52, %v950_v14  ;;  %v2325_v14 = vld [vmem:[%s2942_s2 + $0x10] sm:$0xf] }
 0x174   : > { %v2399_v54 = vpop.f32.mrf.mxu1  ;;  %v1120_v22 = vadd.f32 %v1045_v61, %v948_v17  ;;  %v2328_v17 = vld [vmem:[%s2942_s2 + $0x1c] sm:$0xf] }
 0x175   : > { %v1047_v7 = vpop.f32.mrf.mxu0  ;;  %v1840_v54 = vsub.s32 1, %v1835_v31 }
 0x176   : > { %v1121_v26 = vadd.f32 %v1047_v7, %v949_v19  ;;  %v2322_v7 = vld [vmem:[%s2942_s2 + $0x4] sm:$0xf] }
 0x177   : > { %v1841_v62 = vrot.slane %v1832_v42, %v1840_v54 }
 0x17e   : > { %v1288_v57 = vpop.f32.mrf.mxu1 }
 0x17f   : > { %v1217_v12 = vpop.f32.mrf.mxu0  ;;  %v1294_v23 = vadd.f32 %v1288_v57, %v1122_v18  ;;  %v2329_v18 = vld [vmem:[%s2942_s2 + $0x20] sm:$0xf] }
 0x180   : > { %v2406_v59 = vpop.f32.mrf.mxu1  ;;  %v1292_v28 = vadd.f32 %v1217_v12, %v1120_v22  ;;  %v2323_v12 = vld [vmem:[%s2942_s2 + $0x8] sm:$0xf] }
 0x181   : > { %v1219_v16 = vpop.f32.mrf.mxu0 }
 0x182   : > { %v1293_v32 = vadd.f32 %v1219_v16, %v1121_v26  ;;  %v2327_v16 = vld [vmem:[%s2942_s2 + $0x18] sm:$0xf] }
 0x18a   : > { %v1460_v63 = vpop.f32.mrf.mxu1 }
 0x18b   : > { %v1389_v21 = vpop.f32.mrf.mxu0  ;;  %v1466_v29 = vadd.f32 %v1460_v63, %v1294_v23 }
 0x18c   : > { %v2413_v10 = vpop.f32.mrf.mxu1  ;;  %v1464_v33 = vadd.f32 %v1389_v21, %v1292_v28 }
 0x18d   : > { %v1391_v27 = vpop.f32.mrf.mxu0 }
 0x18e   : > { %v1465_v39 = vadd.f32 %v1391_v27, %v1293_v32 }
 0x196   : > { %v1632_v20 = vpop.f32.mrf.mxu1 }
 0x197   : > { %v1561_v30 = vpop.f32.mrf.mxu0  ;;  %v1638_v34 = vadd.f32 %v1632_v20, %v1466_v29 }
 0x198   : > { %v2420_v24 = vpop.f32.mrf.mxu1  ;;  %v1636_v40 = vadd.f32 %v1561_v30, %v1464_v33 }
 0x199   : > { %v1563_v36 = vpop.f32.mrf.mxu0 }
 0x19a   : > { %v1637_v45 = vadd.f32 %v1563_v36, %v1465_v39 }
 0x1a1   : > { %v1804_v37 = vpop.f32.mrf.mxu1 }
 0x1a2   : > { %v1810_v41 = vadd.f32 %v1804_v37, %v1638_v34 }
 0x1a3   : > { %v1733_v43 = vpop.f32.mrf.mxu0  ;;  %v2427_v44 = vpop.f32.mrf.mxu1 }
 0x1a4   : > { %v1819_v46 = vmul.f32 %v1815_v35, %v1810_v41  ;;  %v1808_v47 = vadd.f32 %v1733_v43, %v1636_v40 }
 0x1a5   : > { %v1735_v48 = vpop.f32.mrf.mxu0 }
 0x1a6   : > { %v1817_v51 = vmul.f32 %v1815_v35, %v1808_v47  ;;  %v1809_v52 = vadd.f32 %v1735_v48, %v1637_v45  ;;  %v1828_v53 = vadd.f32 %v1824_v0, %v1819_v46 }
 0x1a8   : > { %v1818_v55 = vmul.f32 %v1815_v35, %v1809_v52  ;;  %v1826_v56 = vadd.f32 %v1824_v0, %v1817_v51  ;;  %v1831_v57 = vmax.f32 %v1828_v53, 0.0 }
 0x1aa   : > { %v1827_v59 = vadd.f32 %v1824_v0, %v1818_v55  ;;  %v1829_v60 = vmax.f32 %v1826_v56, 0.0  ;;  %v1851_v61 = vmul.f32 %v1845_v49, %v1831_v57 }
 0x1ac   : > { %v1830_v63 = vmax.f32 %v1827_v59, 0.0  ;;  %1860 = vrot.lane.b32.xlu0 %v1851_v61, %s2495_s29  ;;  %v1849_v8 = vmul.f32 %v1837_v58, %v1829_v60 }
 0x1ae   : > { %v1850_v9 = vmul.f32 %v1841_v62, %v1830_v63 }
 0x1b0   : > { %1897 = vperm.xlu0 %2449, %v2322_v7   ;;  %v1857_v10 = vcombine.low %v1849_v8, %v1850_v9 }
 0x1b2   : > { %1858 = vrot.lane.b32.xlu1 %v1857_v10, %s2495_s29 }
 0x1b6   : > { %1879 = vperm.xlu1 %2450, %v1874_v11  }
 0x1ba   : > { %1926 = vperm.xlu1 %2450, %v2323_v12  }
 0x1be   : > { %1955 = vperm.xlu1 %2450, %v2324_v13  }
 0x1c2   : > { %1984 = vperm.xlu1 %2450, %v2325_v14  }
 0x1c6   : > { %2013 = vperm.xlu1 %2450, %v2326_v15  }
 0x1ca   : > { %2042 = vperm.xlu1 %2450, %v2327_v16  }
 0x1ce   : > { %2071 = vperm.xlu1 %2450, %v2328_v17  }
 0x1d2   : > { %2100 = vperm.xlu1 %2450, %v2329_v18  }
 0x21e   : > { %v1861_v21 = vpop.permute.xlu0 %1860 }
 0x224   : > { %v1859_v19 = vpop.permute.xlu1 %1858 }
 0x225   : > { %v1862_v20 = vrot.slane %v1859_v19, 4 }
 0x227   : > { %v1864_v22 = vsel %vm1863_vm12, %v1862_v20, %v1859_v19  ;;  %v1865_v23 = vsel %vm1863_vm12, %v1862_v20, %v1861_v21 }
 0x228   : > { %1871 = vst.msk [vmem:[#allocation2] sm:$0xff] %vm1870_vm13, %v1864_v22 }
 0x229   : > { %1873 = vst.msk [vmem:[#allocation2 + $0x8] sm:$0xf] %vm1872_vm14, %v1865_v23 }
 0x22b   : > { %v1898_v38 = vpop.permute.xlu0 %1897 }
 0x22f   : > { %v2829_v24 = vld [vmem:[#allocation2] sm:$0xff] }
 0x230   : > { %2106 = vrot.lane.b32.xlu1 %v2829_v24, %s2494_s15  ;;  %1903 = vrot.lane.b32.xlu0 %v2829_v24, %s2486_s8  ;;  %v2837_v25 = vcombine.high %v2829_v24, %v2829_v24  ;;  %v1894_v26 = vld [vmem:[#allocation2 + $0x8] sm:$0xf] }
 0x231   : > { %v1923_v27 = vld [vmem:[#allocation2 + $0x8] sm:$0xf] }
 0x232   : > { %v1952_v28 = vld [vmem:[#allocation2 + $0x8] sm:$0xf] }
 0x233   : > { %v1981_v29 = vld [vmem:[#allocation2 + $0x8] sm:$0xf] }
 0x234   : > { %1907 = vrot.lane.b32.xlu0 %v1894_v26, %s2486_s8  ;;  %1905 = vrot.lane.b32.xlu1 %v2837_v25, %s2486_s8  ;;  %v2097_v30 = vld [vmem:[#allocation2 + $0x8] sm:$0xf]  ;;  %s2146_s8 = sld [smem:[#allocation3]] }
 0x235   : > { %v2010_v31 = vld [vmem:[#allocation2 + $0x8] sm:$0xf] }
 0x236   : > { %v2039_v32 = vld [vmem:[#allocation2 + $0x8] sm:$0xf] }
 0x237   : > { %v2068_v33 = vld [vmem:[#allocation2 + $0x8] sm:$0xf] }
 0x238   : > { %1932 = vrot.lane.b32.xlu0 %v2829_v24, %s2487_s9  ;;  %1934 = vrot.lane.b32.xlu1 %v2837_v25, %s2487_s9  ;;  %v1876_v55 = vld [vmem:[#allocation2 + $0x8] sm:$0xf] }
 0x23c   : > { %1936 = vrot.lane.b32.xlu0 %v1923_v27, %s2487_s9  ;;  %1963 = vrot.lane.b32.xlu1 %v2837_v25, %s2488_s10 }
 0x240   : > { %1961 = vrot.lane.b32.xlu0 %v2829_v24, %s2488_s10  ;;  %1992 = vrot.lane.b32.xlu1 %v2837_v25, %s2489_s11 }
 0x244   : > { %1965 = vrot.lane.b32.xlu0 %v1952_v28, %s2488_s10  ;;  %2021 = vrot.lane.b32.xlu1 %v2837_v25, %s2490_s12 }
 0x248   : > { %1990 = vrot.lane.b32.xlu0 %v2829_v24, %s2489_s11  ;;  %2050 = vrot.lane.b32.xlu1 %v2837_v25, %s2491_s13 }
 0x24c   : > { %1994 = vrot.lane.b32.xlu0 %v1981_v29, %s2489_s11  ;;  %2079 = vrot.lane.b32.xlu1 %v2837_v25, %s2492_s14 }
 0x250   : > { %2019 = vrot.lane.b32.xlu0 %v2829_v24, %s2490_s12  ;;  %2110 = vrot.lane.b32.xlu1 %v2097_v30, %s2494_s15 }
 0x254   : > { %2023 = vrot.lane.b32.xlu0 %v2010_v31, %s2490_s12  ;;  %2165 = vrot.lane.b32.xlu1 %v2571_v4, %s2489_s11 }
 0x258   : > { %2048 = vrot.lane.b32.xlu0 %v2829_v24, %s2491_s13  ;;  %2169 = vrot.lane.b32.xlu1 %v2563_v2, %s2489_s11  ;;  %v1880_v2 = vpop.permute.xlu1 %1879 }
 0x259   : > { %v1887_v58 = vmul.f32 %v1880_v2, %v1876_v55  ;;  %v1885_v11 = vmul.f32 %v2829_v24, %v1880_v2  ;;  %v1886_v12 = vmul.f32 %v2837_v25, %v1880_v2 }
 0x25c   : > { %2052 = vrot.lane.b32.xlu0 %v2039_v32, %s2491_s13  ;;  %2173 = vrot.lane.b32.xlu1 %v2569_v3, %s2489_s11  ;;  %v1927_v3 = vpop.permute.xlu1 %1926 }
 0x260   : > { %2077 = vrot.lane.b32.xlu0 %v2829_v24, %s2492_s14  ;;  %v1956_v4 = vpop.permute.xlu1 %1955 }
 0x264   : > { %2081 = vrot.lane.b32.xlu0 %v2068_v33, %s2492_s14  ;;  %v1985_v34 = vpop.permute.xlu1 %1984 }
 0x268   : > { %2108 = vrot.lane.b32.xlu0 %v2837_v25, %s2494_s15  ;;  %v2887_v35 = vpop.permute.xlu1 %2013 }
 0x26c   : > { %2163 = vrot.lane.b32.xlu0 %v2579_v6, %s2489_s11  ;;  %v2889_v36 = vpop.permute.xlu1 %2042 }
 0x270   : > { %2167 = vrot.lane.b32.xlu0 %v2577_v5, %s2489_s11  ;;  %v2891_v37 = vpop.permute.xlu1 %2071 }
 0x274   : > { %2171 = vrot.lane.b32.xlu0 %v2561_v1, %s2489_s11  ;;  %v2893_v39 = vpop.permute.xlu1 %2100  ;;  %s279_s11 = scalar_lea.vmem %s2947_s7, %s2428_s5 }
 0x2a2   : > { %v1904_v6 = vpop.permute.xlu0 %1903  ;;  %v2895_v40 = vpop.permute.xlu1 %2106 }
 0x2a6   : > { %v1908_v5 = vpop.permute.xlu0 %1907  ;;  %v1906_v0 = vpop.permute.xlu1 %1905 }
 0x2a7   : > { %v1916_v52 = vmul.f32 %v1908_v5, %v1898_v38  ;;  %v1909_v53 = vsel %vm307_vm1, %v1904_v6, %v1906_v0  ;;  %v1910_v54 = vsel %vm307_vm1, %v1906_v0, %v1908_v5  ;;  %vm2229_vm1 = vcmask 261120  }
 0x2a8   : > { %v1914_v62 = vmul.f32 %v1909_v53, %v1898_v38  ;;  %v1915_v63 = vmul.f32 %v1910_v54, %v1898_v38 }
 0x2a9   : > { %v1919_v7 = vadd.f32 %v1916_v52, %v1887_v58 }
 0x2aa   : > { %v1933_v41 = vpop.permute.xlu0 %1932  ;;  %v1935_v42 = vpop.permute.xlu1 %1934  ;;  %v1917_v20 = vadd.f32 %v1914_v62, %v1885_v11  ;;  %v1918_v21 = vadd.f32 %v1915_v63, %v1886_v12 }
 0x2ab   : > { %v1938_v59 = vsel %vm621_vm3, %v1933_v41, %v1935_v42 }
 0x2ac   : > { %v1943_v13 = vmul.f32 %v1938_v59, %v1927_v3 }
 0x2ae   : > { %v1937_v1 = vpop.permute.xlu0 %1936  ;;  %v1964_v45 = vpop.permute.xlu1 %1963  ;;  %v1946_v29 = vadd.f32 %v1943_v13, %v1917_v20 }
 0x2af   : > { %v1939_v60 = vsel %vm621_vm3, %v1935_v42, %v1937_v1  ;;  %v1945_v61 = vmul.f32 %v1937_v1, %v1927_v3 }
 0x2b0   : > { %v1944_v14 = vmul.f32 %v1939_v60, %v1927_v3 }
 0x2b1   : > { %v1948_v16 = vadd.f32 %v1945_v61, %v1919_v7 }
 0x2b2   : > { %v1962_v43 = vpop.permute.xlu0 %1961  ;;  %v1993_v47 = vpop.permute.xlu1 %1992  ;;  %v1947_v30 = vadd.f32 %v1944_v14, %v1918_v21 }
 0x2b3   : > { %v1967_v8 = vsel %vm793_vm4, %v1962_v43, %v1964_v45 }
 0x2b4   : > { %v1972_v22 = vmul.f32 %v1967_v8, %v1956_v4 }
 0x2b6   : > { %v1966_v44 = vpop.permute.xlu0 %1965  ;;  %v2022_v50 = vpop.permute.xlu1 %2021  ;;  %v1975_v6 = vadd.f32 %v1972_v22, %v1946_v29 }
 0x2b7   : > { %v1968_v9 = vsel %vm793_vm4, %v1964_v45, %v1966_v44  ;;  %v1974_v10 = vmul.f32 %v1966_v44, %v1956_v4 }
 0x2b8   : > { %v1973_v23 = vmul.f32 %v1968_v9, %v1956_v4 }
 0x2b9   : > { %v1977_v27 = vadd.f32 %v1974_v10, %v1948_v16 }
 0x2ba   : > { %v1991_v46 = vpop.permute.xlu0 %1990  ;;  %v2051_v56 = vpop.permute.xlu1 %2050  ;;  %v1976_v5 = vadd.f32 %v1973_v23, %v1947_v30 }
 0x2bb   : > { %v1996_v17 = vsel %vm965_vm5, %v1991_v46, %v1993_v47 }
 0x2bc   : > { %v2001_v31 = vmul.f32 %v1996_v17, %v1985_v34 }
 0x2be   : > { %v1995_v48 = vpop.permute.xlu0 %1994  ;;  %v2080_v26 = vpop.permute.xlu1 %2079  ;;  %v2004_v43 = vadd.f32 %v2001_v31, %v1975_v6 }
 0x2bf   : > { %v1997_v18 = vsel %vm965_vm5, %v1993_v47, %v1995_v48  ;;  %v2003_v19 = vmul.f32 %v1995_v48, %v1985_v34 }
 0x2c0   : > { %v2002_v32 = vmul.f32 %v1997_v18, %v1985_v34 }
 0x2c1   : > { %v2006_v2 = vadd.f32 %v2003_v19, %v1977_v27 }
 0x2c2   : > { %v2020_v49 = vpop.permute.xlu0 %2019  ;;  %v2005_v44 = vadd.f32 %v2002_v32, %v1976_v5  ;;  %v2111_v34 = vpop.permute.xlu1 %2110 }
 0x2c3   : > { %v2025_v28 = vsel %vm1137_vm6, %v2020_v49, %v2022_v50  ;;  %v2119_v54 = vmul.f32 %v2111_v34, %v2893_v39 }
 0x2c4   : > { %v2030_v41 = vmul.f32 %v2025_v28, %v2887_v35  ;;  %v2147_v28 = vstv %s2146_s8 }
 0x2c6   : > { %v2024_v51 = vpop.permute.xlu0 %2023  ;;  %v2166_v8 = vpop.permute.xlu1 %2165 }
 0x2c7   : > { %v2026_v24 = vsel %vm1137_vm6, %v2022_v50, %v2024_v51  ;;  %v2032_v25 = vmul.f32 %v2024_v51, %v2887_v35  ;;  %v2033_v51 = vadd.f32 %v2030_v41, %v2004_v43 }
 0x2c8   : > { %v2031_v0 = vmul.f32 %v2026_v24, %v2887_v35 }
 0x2c9   : > { %v2035_v1 = vadd.f32 %v2032_v25, %v2006_v2 }
 0x2ca   : > { %v2049_v57 = vpop.permute.xlu0 %2048  ;;  %v2034_v52 = vadd.f32 %v2031_v0, %v2005_v44  ;;  %v2170_v20 = vpop.permute.xlu1 %2169 }
 0x2cb   : > { %v2054_v3 = vsel %vm1309_vm7, %v2049_v57, %v2051_v56 }
 0x2cc   : > { %v2059_v45 = vmul.f32 %v2054_v3, %v2889_v36 }
 0x2ce   : > { %v2053_v15 = vpop.permute.xlu0 %2052  ;;  %v2174_v31 = vpop.permute.xlu1 %2173 }
 0x2cf   : > { %v2055_v38 = vsel %vm1309_vm7, %v2051_v56, %v2053_v15  ;;  %v2061_v4 = vmul.f32 %v2053_v15, %v2889_v36  ;;  %v2062_v56 = vadd.f32 %v2059_v45, %v2033_v51 }
 0x2d0   : > { %v2060_v46 = vmul.f32 %v2055_v38, %v2889_v36 }
 0x2d1   : > { %v2064_v48 = vadd.f32 %v2061_v4, %v2035_v1 }
 0x2d2   : > { %v2078_v33 = vpop.permute.xlu0 %2077  ;;  %v2063_v57 = vadd.f32 %v2060_v46, %v2034_v52 }
 0x2d3   : > { %v2083_v42 = vsel %vm1481_vm8, %v2078_v33, %v2080_v26 }
 0x2d4   : > { %v2088_v35 = vmul.f32 %v2083_v42, %v2891_v37 }
 0x2d6   : > { %v2082_v47 = vpop.permute.xlu0 %2081  ;;  %v2091_v61 = vadd.f32 %v2088_v35, %v2062_v56 }
 0x2d7   : > { %v2084_v49 = vsel %vm1481_vm8, %v2080_v26, %v2082_v47  ;;  %v2090_v50 = vmul.f32 %v2082_v47, %v2891_v37 }
 0x2d8   : > { %v2089_v53 = vmul.f32 %v2084_v49, %v2891_v37 }
 0x2d9   : > { %v2093_v55 = vadd.f32 %v2090_v50, %v2064_v48 }
 0x2da   : > { %v2109_v58 = vpop.permute.xlu0 %2108  ;;  %v2092_v62 = vadd.f32 %v2089_v53, %v2063_v57 }
 0x2db   : > { %v2122_v36 = vadd.f32 %v2119_v54, %v2093_v55  ;;  %v2112_v59 = vsel %vm1653_vm9, %v2895_v40, %v2109_v58  ;;  %v2113_v60 = vsel %vm1653_vm9, %v2109_v58, %v2111_v34 }
 0x2dc   : > { %v2117_v63 = vmul.f32 %v2112_v59, %v2893_v39  ;;  %v2118_v7 = vmul.f32 %v2113_v60, %v2893_v39 }
 0x2dd   : > { %v2139_v37 = vsel %vm2138_vm15, %v2122_v36, 0.0 }
 0x2de   : > { %v2140_v9 = vrot.slane %v2139_v37, 4  ;;  %v2120_v10 = vadd.f32 %v2117_v63, %v2091_v61  ;;  %v2121_v11 = vadd.f32 %v2118_v7, %v2092_v62  ;;  %v2164_v12 = vpop.permute.xlu0 %2163 }
 0x2df   : > { %v2175_v41 = vsel %vm965_vm5, %v2164_v12, %v2166_v8 }
 0x2e0   : > { %v2141_v13 = vadd.f32 %v2140_v9, %v2139_v37  ;;  %v2124_v14 = vsel %vm2123_vm0, %v2120_v10, 0.0  ;;  %v2131_v15 = vsel %vm2123_vm0, %v2121_v11, 0.0 }
 0x2e1   : > { %v2125_v40 = vrot.slane %v2124_v14, 4  ;;  %v2132_v16 = vrot.slane %v2131_v15, 4 }
 0x2e2   : > { %v2142_v17 = vrot.slane %v2141_v13, 2  ;;  %v2168_v23 = vpop.permute.xlu0 %2167 }
 0x2e3   : > { %v2126_v18 = vadd.f32 %v2125_v40, %v2124_v14  ;;  %v2133_v19 = vadd.f32 %v2132_v16, %v2131_v15  ;;  %v2176_v1 = vsel %vm965_vm5, %v2166_v8, %v2168_v23 }
 0x2e4   : > { %v2143_v21 = vadd.f32 %v2142_v17, %v2141_v13 }
 0x2e5   : > { %v2127_v22 = vrot.slane %v2126_v18, 2  ;;  %v2134_v39 = vrot.slane %v2133_v19, 2 }
 0x2e6   : > { %v2144_v26 = vrot.slane %v2143_v21, 1  ;;  %v2172_v3 = vpop.permute.xlu0 %2171 }
 0x2e7   : > { %v2128_v27 = vadd.f32 %v2127_v22, %v2126_v18  ;;  %v2135_v24 = vadd.f32 %v2134_v39, %v2133_v19  ;;  %v2178_v4 = vsel %vm965_vm5, %v2172_v3, %v2174_v31  ;;  %v2177_v43 = vsel %vm965_vm5, %v2170_v20, %v2172_v3 }
 0x2e8   : > { %v2145_v25 = vadd.f32 %v2144_v26, %v2143_v21 }
 0x2e9   : > { %v2129_v29 = vrot.slane %v2128_v27, 1  ;;  %v2136_v30 = vrot.slane %v2135_v24, 1 }
 0x2ea   : > { %v2150_v32 = vadd.f32 %v2147_v28, %v2145_v25 }
 0x2eb   : > { %v2130_v33 = vadd.f32 %v2129_v29, %v2128_v27  ;;  %v2137_v2 = vadd.f32 %v2136_v30, %v2135_v24 }
 0x2ec   : > { %v2187_v38 = vmul.f32 %v2168_v23, %v2150_v32  ;;  %v2190_v6 = vmul.f32 %v2174_v31, %v2150_v32 }
 0x2ed   : > { %v2148_v5 = vadd.f32 %v2147_v28, %v2130_v33  ;;  %v2149_v0 = vadd.f32 %v2147_v28, %v2137_v2 }
 0x2ee   : > { %v2332_v42 = vmul.f32 -1.442695, %v2187_v38  ;;  %v2335_v44 = vmul.f32 -1.442695, %v2190_v6 }
 0x2ef   : > { %v2185_v34 = vmul.f32 %v2175_v41, %v2148_v5  ;;  %v2186_v45 = vmul.f32 %v2176_v1, %v2149_v0  ;;  %v2188_v46 = vmul.f32 %v2177_v43, %v2148_v5  ;;  %v2189_v47 = vmul.f32 %v2178_v4, %v2149_v0 }
 0x2f0   : > { %2452 = vpow2.f32 %v2332_v42 }
 0x2f1   : > { %v2330_v48 = vmul.f32 -1.442695, %v2185_v34  ;;  %v2331_v49 = vmul.f32 -1.442695, %v2186_v45  ;;  %v2333_v50 = vmul.f32 -1.442695, %v2188_v46  ;;  %2454 = vpow2.f32 %v2335_v44 }
 0x2f2   : > { %v2334_v51 = vmul.f32 -1.442695, %v2189_v47 }
 0x2f3   : > { %2456 = vpow2.f32 %v2330_v48 }
 0x2f4   : > { %2458 = vpow2.f32 %v2331_v49 }
 0x2f5   : > { %2460 = vpow2.f32 %v2333_v50 }
 0x2f6   : > { %2462 = vpow2.f32 %v2334_v51 }
 0x2fd   : > { %v2453_v52 = vpop.eup %2452 }
 0x2fe   : > { %v2455_v35 = vpop.eup %2454  ;;  %v2211_v53 = vadd.f32 1.0, %v2453_v52 }
 0x2ff   : > { %v2214_v54 = vadd.f32 1.0, %v2455_v35 }
 0x300   : > { %v2457_v55 = vpop.eup %2456  ;;  %2464 = vrcp.f32 %v2211_v53 }
 0x301   : > { %v2459_v56 = vpop.eup %2458  ;;  %v2209_v57 = vadd.f32 1.0, %v2457_v55  ;;  %2466 = vrcp.f32 %v2214_v54 }
 0x302   : > { %v2461_v58 = vpop.eup %2460  ;;  %v2210_v36 = vadd.f32 1.0, %v2459_v56 }
 0x303   : > { %v2463_v59 = vpop.eup %2462  ;;  %2468 = vrcp.f32 %v2209_v57  ;;  %v2212_v60 = vadd.f32 1.0, %v2461_v58 }
 0x304   : > { %2470 = vrcp.f32 %v2210_v36  ;;  %v2213_v61 = vadd.f32 1.0, %v2463_v59 }
 0x305   : > { %2472 = vrcp.f32 %v2212_v60 }
 0x306   : > { %2474 = vrcp.f32 %v2213_v61 }
 0x30d   : > { %v2465_v62 = vpop.eup %2464 }
 0x30e   : > { %v2467_v63 = vpop.eup %2466  ;;  %2230 = vst.msk [vmem:[%s279_s11 + $0x10] sm:$0xff] %vm2229_vm1, %v2465_v62 }
 0x30f   : > { %2233 = vst.msk [vmem:[%s279_s11 + $0x28] sm:$0xff] %vm2229_vm1, %v2467_v63 }
 0x310   : > { %v2469_v7 = vpop.eup %2468 }
 0x311   : > { %v2471_v37 = vpop.eup %2470  ;;  %2227 = vst [vmem:[%s279_s11] sm:$0xff] %v2469_v7 }
 0x312   : > { %v2473_v8 = vpop.eup %2472  ;;  %2228 = vst [vmem:[%s279_s11 + $0x8] sm:$0xff] %v2471_v37 }
 0x313   : > { %v2475_v9 = vpop.eup %2474  ;;  %2231 = vst [vmem:[%s279_s11 + $0x18] sm:$0xff] %v2473_v8 }
 0x314   : > { %2232 = vst [vmem:[%s279_s11 + $0x20] sm:$0xff] %v2475_v9 }
 0x315 PF: > { %s18_s26 = sadd.s32 1, %s2482_s26  }
 0x316   : > { %p15_p4 = scmp.ge.s32.totalorder %s18_s26, 4  }
 0x318   :  { %17 = sbr.rel (!%p15_p4) target bundleno = 2 (0x2), region = 94 }

</bundles_post_ra>
